<compile_context>
chip_gen: v6e
topology: v6e:2x2x1
jax: 0.10.0
libtpu: 0.0.40
codegen_flags: <defaults>
</compile_context>

<pallas_src>
import functools

import jax
import jax.numpy as jnp
from jax.experimental import pallas as pl
from jax.experimental.pallas import tpu as pltpu


def talking_head_kernel(x_ref, wqkv_ref, wmix_ref, bvec_ref, wp_ref, o_ref,
                        *, bb, n, c, h):
    """One grid step: `bb` full batches (bb*n tokens).

    x_ref:    (bb*n, c)    bf16 tokens of this batch block
    wqkv_ref: (c, 3c)      bf16 QKV weight^T, columns ordered (slot, d, h)
    wmix_ref: (2h, h)      f32  rows 0:h  = (proj_l.weight * scale)^T
                                rows h:2h = proj_w.weight^T
    bvec_ref: (2, c)       f32  row 0[:h] = proj_w.bias, row 1 = proj.bias
    wp_ref:   (c//h, h, c) bf16 proj.weight^T regrouped per head-dim slice d
    o_ref:    (bb*n, c)    f32
    """
    d_head = c // h

    # Fused QKV projection (bf16 x bf16 -> f32 accumulation on the MXU).
    qkv = jnp.dot(x_ref[...], wqkv_ref[...],
                  preferred_element_type=jnp.float32)            # (bb*n, 3c)
    qkv = qkv.reshape(bb, n, 3 * c)

    wmix = wmix_ref[...]
    wl = wmix[0:h, :]                                            # (h, h), scale folded
    ww = wmix[h:2 * h, :]                                        # (h, h)
    bvec = bvec_ref[...]
    bw = bvec[0:1, 0:h]                                          # (1, h)
    bp = bvec[1:2, :]                                            # (1, c)

    # QKV columns are grouped (slot, d, h): each per-d slice is a contiguous
    # (bb, n, h) lane block.
    def q_slice(d):
        return qkv[:, :, d * h:(d + 1) * h]

    def k_slice(d):
        return qkv[:, :, c + d * h:c + (d + 1) * h]

    def v_slice(d):
        return qkv[:, :, 2 * c + d * h:2 * c + (d + 1) * h]

    # Raw attention scores with heads in the lane dim:
    #   s[b, nq, nk, h] = sum_d q[b, h, nq, d] * k[b, h, nk, d]
    # d=0 term initialises s directly (no zeros + add).
    # TODO(synk): if bundle dumps show VALU/XLU saturation at production sizes,
    # repack the key axis into lanes alongside h (block-diagonal mixing weight).
    s = q_slice(0)[:, :, None, :] * k_slice(0)[:, None, :, :]    # (bb, nq, nk, h)
    for d in range(1, d_head):
        s = s + q_slice(d)[:, :, None, :] * k_slice(d)[:, None, :, :]

    # Talking-heads pre-softmax mixing (proj_l) as one lane-contraction matmul.
    # The 1/sqrt(head_dim) scale is folded into wl; proj_l's bias is constant
    # along the key axis the softmax reduces over, so it cancels and is dropped.
    a = jnp.dot(s.reshape(bb * n * n, h), wl,
                preferred_element_type=jnp.float32)              # (bb*n*n, h)

    # One fused softmax over the key axis for all (batch, query, head) rows.
    a = a.reshape(bb * n, n, h)                                  # (bb*nq, nk, h)
    a_max = jnp.max(a, axis=1, keepdims=True)
    e = jnp.exp(a - a_max)
    p = e / jnp.sum(e, axis=1, keepdims=True)                    # exact division

    # Talking-heads post-softmax mixing (proj_w) + bias.
    # (attn_drop / proj_drop are identity at p=0.0 / eval.)
    attn = jnp.dot(p.reshape(bb * n * n, h), ww,
                   preferred_element_type=jnp.float32) + bw      # (bb*n*n, h)
    attn = attn.reshape(bb, n, n, h)

    # attn @ v fused with the head-concat + output projection:
    #   y[(b,nq), :] = sum_d ( sum_nk attn[b,nq,nk,:] * v_d[b,nk,:] ) @ Wp_d
    def head_out(d):
        o_d = jnp.sum(attn * v_slice(d)[:, None, :, :], axis=2)  # (bb, nq, h)
        return jnp.dot(o_d.reshape(bb * n, h).astype(jnp.bfloat16), wp_ref[d],
                       preferred_element_type=jnp.float32)       # (bb*n, c)

    y = head_out(0)
    for d in range(1, d_head):
        y = y + head_out(d)

    o_ref[...] = (y + bp).astype(o_ref.dtype)


def _pick_batch_block(batch, seq, target_tokens=256):
    """Largest divisor of `batch` giving <= target_tokens rows per grid step."""
    bb = max(1, min(batch, target_tokens // max(seq, 1)))
    while batch % bb:
        bb -= 1
    return bb


def talking_head_attn(x, wqkv, wl, bl, ww, bw, wp, bp, *, num_heads=8,
                      batch_block=None):
    """TalkingHeadAttn forward.  x: (B, N, C) f32; weights use the PyTorch
    nn.Linear (out, in) convention.  `bl` (proj_l.bias) is accepted for API
    parity but cancels exactly inside the softmax and is not used."""
    B, N, C = x.shape
    H = num_heads
    if C % H:
        raise ValueError(f"dim {C} not divisible by num_heads {H}")
    Dh = C // H
    scale = Dh ** -0.5
    if wqkv.shape != (3 * C, C) or wl.shape != (H, H) or ww.shape != (H, H):
        raise ValueError("weight shapes inconsistent with x / num_heads")
    if bw.shape != (H,) or wp.shape != (C, C) or bp.shape != (C,):
        raise ValueError("weight shapes inconsistent with x / num_heads")
    del bl  # constant along the softmax (key) axis -> cancels exactly

    bb = batch_block if batch_block is not None else _pick_batch_block(B, N)
    if B % bb:
        raise ValueError(f"batch {B} not divisible by batch_block {bb}")

    # --- operand prep (layout plumbing, done once outside the kernel) -------
    # Tokens: bf16 MXU operand, batch folded into rows.
    x2 = x.reshape(B * N, C).astype(jnp.bfloat16)
    # QKV weight^T with output columns regrouped (slot, h, d) -> (slot, d, h)
    # so per-d head slices are contiguous lane blocks inside the kernel.
    wqkv_k = (wqkv.T.reshape(C, 3, H, Dh).transpose(0, 1, 3, 2)
              .reshape(C, 3 * C).astype(jnp.bfloat16))
    # Talking-heads mixing weights packed into one ref; attention scale folded
    # into the pre-softmax weight.  Kept f32 (tiny 8x8 contractions).
    wmix = jnp.concatenate([(wl * scale).T, ww.T], axis=0).astype(jnp.float32)
    # Biases packed into one ref: row 0 = proj_w.bias (zero-padded), row 1 = proj.bias.
    bvec = jnp.stack([jnp.pad(bw.astype(jnp.float32), (0, C - H)),
                      bp.astype(jnp.float32)])
    # Output projection weight^T regrouped so the head concat fuses into matmuls.
    wp_k = wp.T.reshape(H, Dh, C).transpose(1, 0, 2).astype(jnp.bfloat16)  # (Dh, H, C)

    kernel = functools.partial(talking_head_kernel, bb=bb, n=N, c=C, h=H)
    const2 = lambda i: (0, 0)

    out2 = pl.pallas_call(
        kernel,
        out_shape=jax.ShapeDtypeStruct((B * N, C), jnp.float32),
        grid=(B // bb,),
        in_specs=[
            pl.BlockSpec((bb * N, C), lambda i: (i, 0)),   # tokens: tiled per step
            pl.BlockSpec((C, 3 * C), const2),              # weights: resident
            pl.BlockSpec((2 * H, H), const2),
            pl.BlockSpec((2, C), const2),
            pl.BlockSpec((Dh, H, C), lambda i: (0, 0, 0)),
        ],
        out_specs=pl.BlockSpec((bb * N, C), lambda i: (i, 0)),
        compiler_params=pltpu.CompilerParams(
            dimension_semantics=("parallel",)),  # shard batch blocks over TCs (v7x)
    )(x2, wqkv_k, wmix, bvec, wp_k)
    return out2.reshape(B, N, C)


def reference_forward(x, wqkv, wl, bl, ww, bw, wp, bp, num_heads=8):
    """Pure-JAX (f32) transcription of the PyTorch forward, for verification."""
    B, N, C = x.shape
    H = num_heads
    Dh = C // H
    scale = Dh ** -0.5
    qkv = (x @ wqkv.T).reshape(B, N, 3, H, Dh).transpose(2, 0, 3, 1, 4)
    q, k, v = qkv[0] * scale, qkv[1], qkv[2]
    attn = jnp.einsum('bhnd,bhmd->bhnm', q, k)
    attn = jnp.einsum('bhnm,gh->bgnm', attn, wl) + bl[None, :, None, None]
    attn = jax.nn.softmax(attn, axis=-1)
    attn = jnp.einsum('bhnm,gh->bgnm', attn, ww) + bw[None, :, None, None]
    out = jnp.einsum('bhnm,bhmd->bhnd', attn, v).transpose(0, 2, 1, 3).reshape(B, N, C)
    return out @ wp.T + bp


if __name__ == "__main__":
    B, N, C, H = 2, 8, 32, 8
    key = jax.random.PRNGKey(0)
    ks = jax.random.split(key, 8)
    wqkv = jax.random.normal(ks[0], (3 * C, C), jnp.float32) * 0.1   # qkv.weight
    wl   = jax.random.normal(ks[1], (H, H), jnp.float32) * 0.1       # proj_l.weight
    bl   = jax.random.normal(ks[2], (H,), jnp.float32) * 0.1         # proj_l.bias
    ww   = jax.random.normal(ks[3], (H, H), jnp.float32) * 0.1       # proj_w.weight
    bw   = jax.random.normal(ks[4], (H,), jnp.float32) * 0.1         # proj_w.bias
    wp   = jax.random.normal(ks[5], (C, C), jnp.float32) * 0.1       # proj.weight
    bp   = jax.random.normal(ks[6], (C,), jnp.float32) * 0.1         # proj.bias
    x    = jax.random.normal(ks[7], (B, N, C), jnp.float32)

    # batch_block=1 -> grid=(2,) so the token tiling / resident-weight specs
    # are genuinely exercised even at this tiny test shape.
    out = talking_head_attn(x, wqkv, wl, bl, ww, bw, wp, bp,
                            num_heads=H, batch_block=1)
    out = jax.block_until_ready(out)

    ref = reference_forward(x, wqkv, wl, bl, ww, bw, wp, bp, num_heads=H)
    assert out.shape == (B, N, C)
    # Tolerance 2e-2: the only deviation vs the pure-f32 reference is the bf16
    # cast of the MXU operands (QKV and output-projection matmuls, per perf
    # review).  Softmax uses exact division and all elementwise math is f32.
    assert jnp.allclose(out, ref, atol=2e-2, rtol=2e-2), "mismatch vs pure-JAX reference"

    print("KERNEL_OK")
</pallas_src>

<mosaic_0001>
module attributes {stable_mosaic.version = 11 : i64} {
  func.func @talking_head_kernel(%arg0: i32, %arg1: memref<8x32xbf16, #tpu.memory_space<vmem>>, %arg2: memref<32x96xbf16, #tpu.memory_space<vmem>>, %arg3: memref<16x8xf32, #tpu.memory_space<vmem>>, %arg4: memref<2x32xf32, #tpu.memory_space<vmem>>, %arg5: memref<4x8x32xbf16, #tpu.memory_space<vmem>>, %arg6: memref<8x32xf32, #tpu.memory_space<vmem>>) attributes {dimension_semantics = [#tpu.dimension_semantics<parallel>], iteration_bounds = array<i64: 2>, scalar_prefetch = 0 : i64, scratch_operands = 0 : i64, tpu.core_type = #tpu.core_type<tc>, window_params = [{transform_indices = @transform_0, window_bounds = array<i64: 8, 32>}, {pipeline_mode = #tpu.pipeline_mode<synchronous>, transform_indices = @transform_1, window_bounds = array<i64: 32, 96>}, {pipeline_mode = #tpu.pipeline_mode<synchronous>, transform_indices = @transform_2, window_bounds = array<i64: 16, 8>}, {pipeline_mode = #tpu.pipeline_mode<synchronous>, transform_indices = @transform_3, window_bounds = array<i64: 2, 32>}, {pipeline_mode = #tpu.pipeline_mode<synchronous>, transform_indices = @transform_4, window_bounds = array<i64: 4, 8, 32>}, {transform_indices = @transform_5, window_bounds = array<i64: 8, 32>}]} {
    %c0 = arith.constant 0 : index
    %c0_0 = arith.constant 0 : index
    %0 = vector.load %arg1[%c0, %c0_0] : memref<8x32xbf16, #tpu.memory_space<vmem>>, vector<8x32xbf16>
    %c0_1 = arith.constant 0 : index
    %c0_2 = arith.constant 0 : index
    %1 = vector.load %arg2[%c0_1, %c0_2] : memref<32x96xbf16, #tpu.memory_space<vmem>>, vector<32x96xbf16>
    %cst = arith.constant dense<0.000000e+00> : vector<8x96xf32>
    %2 = tpu.matmul %0, %1, %cst {dimension_numbers = #tpu.dot_dimension_numbers<[1], [0], [0], [1], [0, 0, 1, 1], [], []>} : vector<8x32xbf16>, vector<32x96xbf16>, vector<8x96xf32> -> vector<8x96xf32>
    %3 = vector.shape_cast %2 : vector<8x96xf32> to vector<1x8x96xf32>
    %c0_3 = arith.constant 0 : index
    %c0_4 = arith.constant 0 : index
    %4 = vector.load %arg3[%c0_3, %c0_4] : memref<16x8xf32, #tpu.memory_space<vmem>>, vector<16x8xf32>
    %5 = vector.extract_strided_slice %4 {offsets = [0, 0], sizes = [8, 8], strides = [1, 1]} : vector<16x8xf32> to vector<8x8xf32>
    %6 = vector.extract_strided_slice %4 {offsets = [8, 0], sizes = [8, 8], strides = [1, 1]} : vector<16x8xf32> to vector<8x8xf32>
    %c0_5 = arith.constant 0 : index
    %c0_6 = arith.constant 0 : index
    %7 = vector.load %arg4[%c0_5, %c0_6] : memref<2x32xf32, #tpu.memory_space<vmem>>, vector<2x32xf32>
    %8 = vector.extract_strided_slice %7 {offsets = [0, 0], sizes = [1, 8], strides = [1, 1]} : vector<2x32xf32> to vector<1x8xf32>
    %9 = vector.extract_strided_slice %7 {offsets = [1, 0], sizes = [1, 32], strides = [1, 1]} : vector<2x32xf32> to vector<1x32xf32>
    %10 = vector.extract_strided_slice %3 {offsets = [0, 0, 0], sizes = [1, 8, 8], strides = [1, 1, 1]} : vector<1x8x96xf32> to vector<1x8x8xf32>
    %11 = vector.shape_cast %10 : vector<1x8x8xf32> to vector<1x8x1x8xf32>
    %12 = vector.extract_strided_slice %3 {offsets = [0, 0, 32], sizes = [1, 8, 8], strides = [1, 1, 1]} : vector<1x8x96xf32> to vector<1x8x8xf32>
    %13 = vector.shape_cast %12 : vector<1x8x8xf32> to vector<1x1x8x8xf32>
    %14 = vector.broadcast %11 : vector<1x8x1x8xf32> to vector<1x8x8x8xf32>
    %15 = vector.broadcast %13 : vector<1x1x8x8xf32> to vector<1x8x8x8xf32>
    %16 = arith.mulf %14, %15 : vector<1x8x8x8xf32>
    %17 = vector.extract_strided_slice %3 {offsets = [0, 0, 8], sizes = [1, 8, 8], strides = [1, 1, 1]} : vector<1x8x96xf32> to vector<1x8x8xf32>
    %18 = vector.shape_cast %17 : vector<1x8x8xf32> to vector<1x8x1x8xf32>
    %19 = vector.extract_strided_slice %3 {offsets = [0, 0, 40], sizes = [1, 8, 8], strides = [1, 1, 1]} : vector<1x8x96xf32> to vector<1x8x8xf32>
    %20 = vector.shape_cast %19 : vector<1x8x8xf32> to vector<1x1x8x8xf32>
    %21 = vector.broadcast %18 : vector<1x8x1x8xf32> to vector<1x8x8x8xf32>
    %22 = vector.broadcast %20 : vector<1x1x8x8xf32> to vector<1x8x8x8xf32>
    %23 = arith.mulf %21, %22 : vector<1x8x8x8xf32>
    %24 = arith.addf %16, %23 : vector<1x8x8x8xf32>
    %25 = vector.extract_strided_slice %3 {offsets = [0, 0, 16], sizes = [1, 8, 8], strides = [1, 1, 1]} : vector<1x8x96xf32> to vector<1x8x8xf32>
    %26 = vector.shape_cast %25 : vector<1x8x8xf32> to vector<1x8x1x8xf32>
    %27 = vector.extract_strided_slice %3 {offsets = [0, 0, 48], sizes = [1, 8, 8], strides = [1, 1, 1]} : vector<1x8x96xf32> to vector<1x8x8xf32>
    %28 = vector.shape_cast %27 : vector<1x8x8xf32> to vector<1x1x8x8xf32>
    %29 = vector.broadcast %26 : vector<1x8x1x8xf32> to vector<1x8x8x8xf32>
    %30 = vector.broadcast %28 : vector<1x1x8x8xf32> to vector<1x8x8x8xf32>
    %31 = arith.mulf %29, %30 : vector<1x8x8x8xf32>
    %32 = arith.addf %24, %31 : vector<1x8x8x8xf32>
    %33 = vector.extract_strided_slice %3 {offsets = [0, 0, 24], sizes = [1, 8, 8], strides = [1, 1, 1]} : vector<1x8x96xf32> to vector<1x8x8xf32>
    %34 = vector.shape_cast %33 : vector<1x8x8xf32> to vector<1x8x1x8xf32>
    %35 = vector.extract_strided_slice %3 {offsets = [0, 0, 56], sizes = [1, 8, 8], strides = [1, 1, 1]} : vector<1x8x96xf32> to vector<1x8x8xf32>
    %36 = vector.shape_cast %35 : vector<1x8x8xf32> to vector<1x1x8x8xf32>
    %37 = vector.broadcast %34 : vector<1x8x1x8xf32> to vector<1x8x8x8xf32>
    %38 = vector.broadcast %36 : vector<1x1x8x8xf32> to vector<1x8x8x8xf32>
    %39 = arith.mulf %37, %38 : vector<1x8x8x8xf32>
    %40 = arith.addf %32, %39 : vector<1x8x8x8xf32>
    %41 = vector.shape_cast %40 : vector<1x8x8x8xf32> to vector<64x8xf32>
    %cst_7 = arith.constant dense<0.000000e+00> : vector<64x8xf32>
    %42 = tpu.matmul %41, %5, %cst_7 {dimension_numbers = #tpu.dot_dimension_numbers<[1], [0], [0], [1], [0, 0, 1, 1], [], []>} : vector<64x8xf32>, vector<8x8xf32>, vector<64x8xf32> -> vector<64x8xf32>
    %43 = vector.shape_cast %42 : vector<64x8xf32> to vector<8x8x8xf32>
    %cst_8 = arith.constant dense<0xFF800000> : vector<8x8xf32>
    %44 = vector.multi_reduction <maximumf>, %43, %cst_8 [1] : vector<8x8x8xf32> to vector<8x8xf32>
    %45 = vector.shape_cast %44 : vector<8x8xf32> to vector<8x1x8xf32>
    %46 = vector.broadcast %45 : vector<8x1x8xf32> to vector<8x8x8xf32>
    %47 = arith.subf %43, %46 : vector<8x8x8xf32>
    %48 = math.exp %47 : vector<8x8x8xf32>
    %cst_9 = arith.constant dense<0.000000e+00> : vector<8x8xf32>
    %49 = vector.multi_reduction <add>, %48, %cst_9 [1] : vector<8x8x8xf32> to vector<8x8xf32>
    %50 = vector.shape_cast %49 : vector<8x8xf32> to vector<8x1x8xf32>
    %51 = vector.broadcast %50 : vector<8x1x8xf32> to vector<8x8x8xf32>
    %52 = arith.divf %48, %51 : vector<8x8x8xf32>
    %53 = vector.shape_cast %52 : vector<8x8x8xf32> to vector<64x8xf32>
    %cst_10 = arith.constant dense<0.000000e+00> : vector<64x8xf32>
    %54 = tpu.matmul %53, %6, %cst_10 {dimension_numbers = #tpu.dot_dimension_numbers<[1], [0], [0], [1], [0, 0, 1, 1], [], []>} : vector<64x8xf32>, vector<8x8xf32>, vector<64x8xf32> -> vector<64x8xf32>
    %55 = vector.broadcast %8 : vector<1x8xf32> to vector<64x8xf32>
    %56 = arith.addf %54, %55 : vector<64x8xf32>
    %57 = vector.shape_cast %56 : vector<64x8xf32> to vector<1x8x8x8xf32>
    %58 = vector.extract_strided_slice %3 {offsets = [0, 0, 64], sizes = [1, 8, 8], strides = [1, 1, 1]} : vector<1x8x96xf32> to vector<1x8x8xf32>
    %59 = vector.shape_cast %58 : vector<1x8x8xf32> to vector<1x1x8x8xf32>
    %60 = vector.broadcast %59 : vector<1x1x8x8xf32> to vector<1x8x8x8xf32>
    %61 = arith.mulf %57, %60 : vector<1x8x8x8xf32>
    %cst_11 = arith.constant dense<0.000000e+00> : vector<1x8x8xf32>
    %62 = vector.multi_reduction <add>, %61, %cst_11 [2] : vector<1x8x8x8xf32> to vector<1x8x8xf32>
    %63 = vector.shape_cast %62 : vector<1x8x8xf32> to vector<8x8xf32>
    %64 = arith.truncf %63 : vector<8x8xf32> to vector<8x8xbf16>
    %c0_12 = arith.constant 0 : index
    %c0_13 = arith.constant 0 : index
    %c0_14 = arith.constant 0 : index
    %65 = vector.load %arg5[%c0_12, %c0_13, %c0_14] : memref<4x8x32xbf16, #tpu.memory_space<vmem>>, vector<1x8x32xbf16>
    %66 = vector.shape_cast %65 : vector<1x8x32xbf16> to vector<8x32xbf16>
    %cst_15 = arith.constant dense<0.000000e+00> : vector<8x32xf32>
    %67 = tpu.matmul %64, %66, %cst_15 {dimension_numbers = #tpu.dot_dimension_numbers<[1], [0], [0], [1], [0, 0, 1, 1], [], []>} : vector<8x8xbf16>, vector<8x32xbf16>, vector<8x32xf32> -> vector<8x32xf32>
    %68 = vector.extract_strided_slice %3 {offsets = [0, 0, 72], sizes = [1, 8, 8], strides = [1, 1, 1]} : vector<1x8x96xf32> to vector<1x8x8xf32>
    %69 = vector.shape_cast %68 : vector<1x8x8xf32> to vector<1x1x8x8xf32>
    %70 = vector.broadcast %69 : vector<1x1x8x8xf32> to vector<1x8x8x8xf32>
    %71 = arith.mulf %57, %70 : vector<1x8x8x8xf32>
    %cst_16 = arith.constant dense<0.000000e+00> : vector<1x8x8xf32>
    %72 = vector.multi_reduction <add>, %71, %cst_16 [2] : vector<1x8x8x8xf32> to vector<1x8x8xf32>
    %73 = vector.shape_cast %72 : vector<1x8x8xf32> to vector<8x8xf32>
    %74 = arith.truncf %73 : vector<8x8xf32> to vector<8x8xbf16>
    %c1 = arith.constant 1 : index
    %c0_17 = arith.constant 0 : index
    %c0_18 = arith.constant 0 : index
    %75 = vector.load %arg5[%c1, %c0_17, %c0_18] : memref<4x8x32xbf16, #tpu.memory_space<vmem>>, vector<1x8x32xbf16>
    %76 = vector.shape_cast %75 : vector<1x8x32xbf16> to vector<8x32xbf16>
    %cst_19 = arith.constant dense<0.000000e+00> : vector<8x32xf32>
    %77 = tpu.matmul %74, %76, %cst_19 {dimension_numbers = #tpu.dot_dimension_numbers<[1], [0], [0], [1], [0, 0, 1, 1], [], []>} : vector<8x8xbf16>, vector<8x32xbf16>, vector<8x32xf32> -> vector<8x32xf32>
    %78 = arith.addf %67, %77 : vector<8x32xf32>
    %79 = vector.extract_strided_slice %3 {offsets = [0, 0, 80], sizes = [1, 8, 8], strides = [1, 1, 1]} : vector<1x8x96xf32> to vector<1x8x8xf32>
    %80 = vector.shape_cast %79 : vector<1x8x8xf32> to vector<1x1x8x8xf32>
    %81 = vector.broadcast %80 : vector<1x1x8x8xf32> to vector<1x8x8x8xf32>
    %82 = arith.mulf %57, %81 : vector<1x8x8x8xf32>
    %cst_20 = arith.constant dense<0.000000e+00> : vector<1x8x8xf32>
    %83 = vector.multi_reduction <add>, %82, %cst_20 [2] : vector<1x8x8x8xf32> to vector<1x8x8xf32>
    %84 = vector.shape_cast %83 : vector<1x8x8xf32> to vector<8x8xf32>
    %85 = arith.truncf %84 : vector<8x8xf32> to vector<8x8xbf16>
    %c2 = arith.constant 2 : index
    %c0_21 = arith.constant 0 : index
    %c0_22 = arith.constant 0 : index
    %86 = vector.load %arg5[%c2, %c0_21, %c0_22] : memref<4x8x32xbf16, #tpu.memory_space<vmem>>, vector<1x8x32xbf16>
    %87 = vector.shape_cast %86 : vector<1x8x32xbf16> to vector<8x32xbf16>
    %cst_23 = arith.constant dense<0.000000e+00> : vector<8x32xf32>
    %88 = tpu.matmul %85, %87, %cst_23 {dimension_numbers = #tpu.dot_dimension_numbers<[1], [0], [0], [1], [0, 0, 1, 1], [], []>} : vector<8x8xbf16>, vector<8x32xbf16>, vector<8x32xf32> -> vector<8x32xf32>
    %89 = arith.addf %78, %88 : vector<8x32xf32>
    %90 = vector.extract_strided_slice %3 {offsets = [0, 0, 88], sizes = [1, 8, 8], strides = [1, 1, 1]} : vector<1x8x96xf32> to vector<1x8x8xf32>
    %91 = vector.shape_cast %90 : vector<1x8x8xf32> to vector<1x1x8x8xf32>
    %92 = vector.broadcast %91 : vector<1x1x8x8xf32> to vector<1x8x8x8xf32>
    %93 = arith.mulf %57, %92 : vector<1x8x8x8xf32>
    %cst_24 = arith.constant dense<0.000000e+00> : vector<1x8x8xf32>
    %94 = vector.multi_reduction <add>, %93, %cst_24 [2] : vector<1x8x8x8xf32> to vector<1x8x8xf32>
    %95 = vector.shape_cast %94 : vector<1x8x8xf32> to vector<8x8xf32>
    %96 = arith.truncf %95 : vector<8x8xf32> to vector<8x8xbf16>
    %c3 = arith.constant 3 : index
    %c0_25 = arith.constant 0 : index
    %c0_26 = arith.constant 0 : index
    %97 = vector.load %arg5[%c3, %c0_25, %c0_26] : memref<4x8x32xbf16, #tpu.memory_space<vmem>>, vector<1x8x32xbf16>
    %98 = vector.shape_cast %97 : vector<1x8x32xbf16> to vector<8x32xbf16>
    %cst_27 = arith.constant dense<0.000000e+00> : vector<8x32xf32>
    %99 = tpu.matmul %96, %98, %cst_27 {dimension_numbers = #tpu.dot_dimension_numbers<[1], [0], [0], [1], [0, 0, 1, 1], [], []>} : vector<8x8xbf16>, vector<8x32xbf16>, vector<8x32xf32> -> vector<8x32xf32>
    %100 = arith.addf %89, %99 : vector<8x32xf32>
    %101 = vector.broadcast %9 : vector<1x32xf32> to vector<8x32xf32>
    %102 = arith.addf %100, %101 : vector<8x32xf32>
    %c0_28 = arith.constant 0 : index
    %c0_29 = arith.constant 0 : index
    %103 = vector.load %arg6[%c0_28, %c0_29] : memref<8x32xf32, #tpu.memory_space<vmem>>, vector<8x32xf32>
    tpu.vector_store %arg6[%c0_28, %c0_29], %102 {strides = array<i32>} : memref<8x32xf32, #tpu.memory_space<vmem>>, vector<8x32xf32>,
    return
  }
  func.func @transform_0(%arg0: i32) -> (i32, i32) {
    %c0_i32 = arith.constant 0 : i32
    %c0_i32_0 = arith.constant 0 : i32
    return %arg0, %c0_i32 : i32, i32
  }
  func.func @transform_1(%arg0: i32) -> (i32, i32) {
    %c0_i32 = arith.constant 0 : i32
    %c0_i32_0 = arith.constant 0 : i32
    %c0_i32_1 = arith.constant 0 : i32
    return %c0_i32, %c0_i32_0 : i32, i32
  }
  func.func @transform_2(%arg0: i32) -> (i32, i32) {
    %c0_i32 = arith.constant 0 : i32
    %c0_i32_0 = arith.constant 0 : i32
    %c0_i32_1 = arith.constant 0 : i32
    return %c0_i32, %c0_i32_0 : i32, i32
  }
  func.func @transform_3(%arg0: i32) -> (i32, i32) {
    %c0_i32 = arith.constant 0 : i32
    %c0_i32_0 = arith.constant 0 : i32
    %c0_i32_1 = arith.constant 0 : i32
    return %c0_i32, %c0_i32_0 : i32, i32
  }
  func.func @transform_4(%arg0: i32) -> (i32, i32, i32) {
    %c0_i32 = arith.constant 0 : i32
    %c0_i32_0 = arith.constant 0 : i32
    %c0_i32_1 = arith.constant 0 : i32
    %c0_i32_2 = arith.constant 0 : i32
    return %c0_i32, %c0_i32_0, %c0_i32_1 : i32, i32, i32
  }
  func.func @transform_5(%arg0: i32) -> (i32, i32) {
    %c0_i32 = arith.constant 0 : i32
    %c0_i32_0 = arith.constant 0 : i32
    return %arg0, %c0_i32 : i32, i32
  }
}

</mosaic_0001>

<bundles_post_ra>
// kernel: tpu_custom_call.1
= control target key start
LH: loop header
LB: loop body
LE: loop exit
PB: predicated region body
PF: predicated region fallthrough
CT: control target
= control target key end

     0   :  { %10 = vsyncpa [#allocation3], 0  ;;  %s2446_s0 = inlined_call_operand.vmem [shape: bf16[16,32], index: 0, kind: input, shape index: {}]   ;;  %s2447_s1 = inlined_call_operand.vmem [shape: bf16[32,96], index: 1, kind: input, shape index: {}]   ;;  %s2448_s2 = inlined_call_operand.vmem [shape: f32[16,8], index: 2, kind: input, shape index: {}]   ;;  %s2449_s3 = inlined_call_operand.vmem [shape: f32[2,32], index: 3, kind: input, shape index: {}]   ;;  %s2450_s4 = inlined_call_operand.hbm [shape: bf16[4,8,32], index: 4, kind: input, shape index: {}]   ;;  %s2451_s5 = inlined_call_operand.hbm [shape: f32[16,32], index: 5, kind: output, shape index: {}]  }
   0x1   :  { %11 = vsyncpa [#allocation4], 0 }
   0x2   :  { %13 = vsyncpa [#allocation4 + $0x1], 0  ;;  %s1966_s18 = smov 0   ;;  %s1968_s19 = smov 0  }
   0x3   :  { %s1970_s20 = smov 0   ;;  %s1972_s21 = smov 0  }
   0x4 LB: > { %s1987_s22 = sadd.s32 4294967295, %s1919_s21   ;;  %s1608_s23 = sadd.s32 4294967294, %s1919_s21   ;;  %s1919_s21 = sphi %s1972_s21, %s2459_s21   ;;  %s1915_s20 = sphi %s1970_s20, %s2458_s20   ;;  %s1911_s19 = sphi %s1968_s19, %s2457_s19   ;;  %s1907_s18 = sphi %s1966_s18, %s2456_s18  }
   0x5   : > { %s1991_s24 = sadd.s32 1, %s1919_s21   ;;  %s136_s25 = sadd.s32 1, %s1915_s20 }
   0x6   : > { %s133_s26 = ssub.s32 %s1919_s21, %s1991_s24  ;;  %p146_p0 = scmp.ne.s32.totalorder %s1915_s20, %s1911_s19 }
   0x7   : > { %p134_p1 = scmp.eq.s32.totalorder %s133_s26, 0  ;;  %p147_p2 = scmp.eq.s32.totalorder %s1987_s22, 1 }
   0x8   : > { %p152_p3 = scmp.ne.s32.totalorder %s1911_s19, %s1907_s18  ;;  %p153_p4 = scmp.eq.s32.totalorder %s1608_s23, 1 }
   0x9   : > { %s2002_s27 = scalar_select %p134_p1, %s1915_s20, %s136_s25  }
   0xa   : > { %p2004_p5 = por %p147_p2, %p146_p0  ;;  %p2008_p6 = por %p153_p4, %p152_p3 }
   0xb   : > { %p1609_p7 = scmp.ge.s32.totalorder %s1919_s21, 1  ;;  %p160_p8 = scmp.lt.s32.totalorder %s1919_s21, 3 }
   0xc   : > { %s2453_s29 = scalar_select %p2008_p6, 1, 0 }
   0xd   : > { %p1746_p9 = scmp.eq.s32.totalorder %s1987_s22, 0  ;;  %p2015_p10 = pnand %p1609_p7, %p160_p8 }
   0xe   : > { %s1921_s6 = smov [#allocation2]  }
   0xf   : > { %s181_s7 = sshll.u32 %s1921_s6, 4  ;;  %p1738_p11 = pneg %p2015_p10  ;;  %s182_s7 = int_to_ptr.vmem [resolvable:$true] %s181_s7 }
  0x10   : > { %s1840_s8 = scalar_lea.vmem %s182_s7, 256  ;;  %p1848_p3 = scmp.lt.s32.totalorder %s182_s7, %s182_s7 }
  0x11   : > { %p1739_p12 = pnand %p1746_p9, %p1738_p11  ;;  %p1841_p0 = scmp.ne.s32.totalorder %s182_s7, %s1840_s8 }
  0x12   : > { %p1849_p4 = scmp.lt.s32.totalorder %s1840_s8, %s1840_s8 }
  0x13   : > { %p1831_p13 = pneg %p1739_p12 }
  0x14   : > { %p1850_p6 = por %p1849_p4, %p1848_p3 }
  0x15   : > { %p1843_p1 = pnand %p1841_p0, %p1831_p13 }
  0x17   : > { %p1844_p2 = pneg %p1843_p1 }
  0x19   : > { %p1851_p7 = pnand %p1850_p6, %p1844_p2 }
  0x1b   : > { %1854 = shalt.err (!%p1851_p7)
}
  0x1c   : > { %s1922_s9 = smov 64   ;;  %s1923_s10 = smov 4  }
  0x1d   : > { %1741 = dma.hbm_to_vmem [thread:$0]  (!%p1739_p12), %s2450_s4, 256, %s182_s7, [#allocation3], %s1922_s9, %s1922_s9, %s1923_s10  }
  0x1e   : > { %204 = sbr.rel (%p2015_p10) target bundleno = 1249 (0x4e1), region = 40 }
  0x23   : > { %1898 = dma.done.wait (%p1746_p9), [#allocation3], 256  }
  0x24   : > { %1900 = vsyncadd (%p1746_p9), [#allocation3], 4294967040  ;;  %p231_p8 = scmp.lt.s32.totalorder %s1987_s22, 1  ;;  %v1924_v0 = vmov 0.0   ;;  %vm1925_vm0 = vmmov 0   ;;  %v1795_v1 = vld [vmem:[%s2447_s1 + $0x8] sm:$0xff]   ;;  %v305_v10 = vlaneseq }
  0x25   : > { %1672 = vmatprep.subr.bf16.mxu0 %v1924_v0  ;;  %1676 = vmatprep.mubr.msk.bf16.mxu0 %vm1925_vm0, %v1924_v0  ;;  %v1796_v2 = vld [vmem:[%s2447_s1] sm:$0xff]   ;;  %vm253_vm1 = vcmask 261120   ;;  %s1926_s6 = smov 96   ;;  %v1927_v8 = vmov 1966171168   ;;  %s1928_s9 = smov 120  }
  0x26   : > { %s232_s13 = scalar_select %p231_p8, %s1987_s22, 1  ;;  %1673 = vmatpush3.bf16.msra.mxu0 %v1795_v1  ;;  %v303_v9 = vunpack.c.l.s4 %v1927_v8  ;;  %v2051_v12 = vshrl.u32 %v305_v10, 7  ;;  %v297_v24 = vld [vmem:[%s2448_s2] sm:$0xff]  ;;  %vm505_vm2 = vcmask 64512   ;;  %vm1107_vm3 = vcmask 1043456  }
  0x27   : > { %1674 = vmatprep.subr.bf16.mxu0 %v1924_v0  ;;  %1680 = vmatprep.subr.mxu1 %v297_v24  ;;  %s1929_s10 = smov 112   ;;  %s1930_s11 = smov 104   ;;  %vm1089_vm4 = vcmask 1041409   ;;  %vm1091_vm5 = vcmask 1042434   ;;  %vm1093_vm6 = vcmask 1043459   ;;  %vm1095_vm7 = vcmask 1044484  }
  0x28   : > { %s1615_s16 = sshll.u32 %s232_s13, 2  ;;  %v304_v11 = vunpack.c.0.s8 %v303_v9  ;;  %v2056_v17 = vsub.s32 0, %v2051_v12  ;;  %1681 = vmatpush3.msra.mxu1 %v297_v24  ;;  %s1931_s12 = smov 64   ;;  %vm1097_vm8 = vcmask 1045509   ;;  %vm1099_vm9 = vcmask 1046534  }
  0x29   : > { %s234_s30 = scalar_lea.vmem %s2446_s0, %s1615_s16  ;;  %1708 = vmatprep.subr.bf16.mxu1 %v1924_v0  ;;  %s1932_s13 = smov 56   ;;  %vm1101_vm10 = vcmask 1047559  }
  0x2a   : > { %1675 = vmatpush3.bf16.msra.mxu0 %v1796_v2  ;;  %v236_v3 = vld [vmem:[%s234_s30] sm:$0xf]  ;;  %v307_v13 = vsub.s32 %v304_v11, %v2051_v12  ;;  %s1933_s14 = smov 40   ;;  %s1934_s15 = smov 48  }
  0x2b   : > { %s228_s26 = sand.u32 1, %s1911_s19  }
  0x2c   : > { %s1614_s30 = sshll.u32 %s228_s26, 3 }
  0x2d   : > { %1677 = vmatmul.mubr.msk.bf16.vlgmr.msra.gmra.mxu0 %vm253_vm1, %v236_v3  ;;  %s230_s7 = scalar_lea.vmem [#allocation5], %s1614_s30 }
  0x2e   : > { %s1537_s8 = sshll.u32 %s230_s7, 4  ;;  %s2406_s8 = int_to_ptr.vmem [resolvable:$true] %s1537_s8 }
  0xed   : > { %v2048_v4 = vpop.f32.mrf.mxu0 }
  0xee   : > { %390 = vrot.lane.b32.xlu0 %v2048_v4, %s1926_s6  ;;  %v308_v14 = vrot.slane %v2048_v4, %v307_v13  ;;  %v301_v28 = vcombine.high %v2048_v4, %v2048_v4  ;;  %s1640_s6 = sshll.u32 %s1987_s22, 7  ;;  %s1524_s22 = scalar_lea.sflag [#allocation4], %s228_s26 }
  0xef   : > { %v1678_v5 = vpop.f32.mrf.mxu0 }
  0xf0   : > { %v316_v15 = vcombine.high %v308_v14, %v308_v14  ;;  %v324_v16 = vrot.slane %v308_v14, %v307_v13  ;;  %v315_v31 = vrot.slane %v301_v28, %v307_v13 }
  0xf1   : > { %v294_v6 = vpop.f32.mrf.mxu0 }
  0xf2   : > { %v338_v18 = vrot.slane %v316_v15, %v307_v13  ;;  %v353_v19 = vrot.slane %v324_v16, %v2056_v17  ;;  %v346_v25 = vcombine.high %v324_v16, %v324_v16  ;;  %v331_v33 = vrot.slane %v315_v31, %v307_v13 }
  0xf3   : > { %v1679_v7 = vpop.f32.mrf.mxu0  ;;  %v317_v34 = vcombine.high %v315_v31, %v315_v31 }
  0xf4   : > { %v357_v20 = vrot.slane %v338_v18, %v2056_v17  ;;  %v361_v26 = vrot.slane %v346_v25, %v2056_v17  ;;  %v348_v27 = vcombine.high %v338_v18, %v338_v18  ;;  %v369_v35 = vrot.slane %v331_v33, %v2056_v17 }
  0xf5   : > { %v345_v36 = vrot.slane %v317_v34, %v307_v13  ;;  %v347_v40 = vcombine.high %v331_v33, %v331_v33  ;;  %v298_v33 = vld [vmem:[%s2448_s2 + $0x8] sm:$0xff] }
  0xf6   : > { %v365_v30 = vrot.slane %v348_v27, %v2056_v17  ;;  %1694 = vmatprep.subr.mxu0 %v298_v33 }
  0xf7   : > { %v373_v38 = vrot.slane %v345_v36, %v2056_v17  ;;  %v377_v41 = vrot.slane %v347_v40, %v2056_v17  ;;  %v349_v42 = vcombine.high %v345_v36, %v345_v36  ;;  %1695 = vmatpush3.msra.mxu0 %v298_v33 }
  0xf8   : > { %1720 = vmatprep.subr.bf16.mxu0 %v1924_v0 }
  0xf9   : > { %v381_v44 = vrot.slane %v349_v42, %v2056_v17 }
 0x160   : > { %v391_v21 = vpop.permute.xlu0 %390 }
 0x161   : > { %v2060_v22 = vmul.f32 %v391_v21, %v353_v19  ;;  %v2062_v23 = vmul.f32 %v391_v21, %v357_v20  ;;  %v2079_v29 = vmul.f32 %v391_v21, %v361_v26  ;;  %v2086_v32 = vmul.f32 %v391_v21, %v365_v30 }
 0x162   : > { %v2097_v37 = vmul.f32 %v391_v21, %v369_v35  ;;  %v2104_v39 = vmul.f32 %v391_v21, %v373_v38  ;;  %v2115_v43 = vmul.f32 %v391_v21, %v377_v41  ;;  %v2122_v45 = vmul.f32 %v391_v21, %v381_v44 }
 0x163   : > { %409 = vrot.lane.b32.xlu0 %v2060_v22, %s1928_s9  ;;  %411 = vrot.lane.b32.xlu1 %v2062_v23, %s1928_s9 }
 0x167   : > { %443 = vrot.lane.b32.xlu0 %v2062_v23, %s1929_s10  ;;  %441 = vrot.lane.b32.xlu1 %v2060_v22, %s1929_s10 }
 0x16b   : > { %473 = vrot.lane.b32.xlu0 %v2060_v22, %s1930_s11  ;;  %413 = vrot.lane.b32.xlu1 %v2079_v29, %s1928_s9 }
 0x16f   : > { %475 = vrot.lane.b32.xlu0 %v2062_v23, %s1930_s11  ;;  %415 = vrot.lane.b32.xlu1 %v2086_v32, %s1928_s9 }
 0x173   : > { %447 = vrot.lane.b32.xlu0 %v2086_v32, %s1929_s10  ;;  %445 = vrot.lane.b32.xlu1 %v2079_v29, %s1929_s10 }
 0x177   : > { %477 = vrot.lane.b32.xlu0 %v2079_v29, %s1930_s11  ;;  %417 = vrot.lane.b32.xlu1 %v2097_v37, %s1928_s9 }
 0x17b   : > { %479 = vrot.lane.b32.xlu0 %v2086_v32, %s1930_s11  ;;  %419 = vrot.lane.b32.xlu1 %v2104_v39, %s1928_s9 }
 0x17f   : > { %451 = vrot.lane.b32.xlu0 %v2104_v39, %s1929_s10  ;;  %449 = vrot.lane.b32.xlu1 %v2097_v37, %s1929_s10 }
 0x183   : > { %481 = vrot.lane.b32.xlu0 %v2097_v37, %s1930_s11  ;;  %421 = vrot.lane.b32.xlu1 %v2115_v43, %s1928_s9 }
 0x187   : > { %483 = vrot.lane.b32.xlu0 %v2104_v39, %s1930_s11  ;;  %423 = vrot.lane.b32.xlu1 %v2122_v45, %s1928_s9 }
 0x18b   : > { %455 = vrot.lane.b32.xlu0 %v2122_v45, %s1929_s10  ;;  %453 = vrot.lane.b32.xlu1 %v2115_v43, %s1929_s10 }
 0x18f   : > { %487 = vrot.lane.b32.xlu0 %v2122_v45, %s1930_s11  ;;  %485 = vrot.lane.b32.xlu1 %v2115_v43, %s1930_s11  ;;  %s2404_s11 = scalar_lea.hbm %s2451_s5, %s1640_s6 }
 0x193   : > { %920 = vrot.lane.b32.xlu0 %v2048_v4, %s1931_s12  ;;  %996 = vrot.lane.b32.xlu1 %v2048_v4, %s1932_s13  ;;  %s1855_s12 = scalar_lea.vmem %s2406_s8, 128  ;;  %s1935_s13 = smov [#allocation5]  }
 0x194   : > { %p1856_p6 = scmp.ne.s32.totalorder %s2406_s8, %s1855_s12 }
 0x196   : > { %p1857_p9 = pnand %p1856_p6, %p2004_p5 }
 0x197   : > { %1369 = vrot.lane.b32.xlu0 %v2048_v4, %s1933_s14  ;;  %1221 = vrot.lane.b32.xlu1 %v2048_v4, %s1934_s15  ;;  %s1859_s14 = sshll.u32 %s1935_s13, 4  ;;  %s1860_s14 = int_to_ptr.vmem [resolvable:$false] %s1859_s14 }
 0x198   : > { %p1858_p10 = pneg %p1857_p9  ;;  %s1861_s15 = scalar_lea.vmem %s1860_s14, 256 }
 0x199   : > { %p1862_p11 = scmp.lt.s32.totalorder %s2406_s8, %s1860_s14  ;;  %p1863_p12 = scmp.lt.s32.totalorder %s1861_s15, %s1855_s12 }
 0x19b   : > { %p1864_p13 = por %p1863_p12, %p1862_p11 }
 0x19d   : > { %p1865_p0 = pnand %p1864_p13, %p1858_p10 }
 0x1d5   : > { %v410_v46 = vpop.permute.xlu0 %409  ;;  %v412_v47 = vpop.permute.xlu1 %411 }
 0x1d6   : > { %v433_v50 = vadd.f32 %v410_v46, %v2060_v22  ;;  %v434_v54 = vadd.f32 %v412_v47, %v2062_v23 }
 0x1d9   : > { %v444_v48 = vpop.permute.xlu0 %443  ;;  %v442_v49 = vpop.permute.xlu1 %441 }
 0x1da   : > { %v465_v51 = vadd.f32 %v442_v49, %v433_v50  ;;  %v466_v56 = vadd.f32 %v444_v48, %v434_v54 }
 0x1dd   : > { %v474_v52 = vpop.permute.xlu0 %473  ;;  %v414_v53 = vpop.permute.xlu1 %413 }
 0x1de   : > { %v497_v55 = vadd.f32 %v474_v52, %v465_v51  ;;  %v435_v62 = vadd.f32 %v414_v53, %v2079_v29 }
 0x1e0   : > { %1682 = vmatprep.mubr.msk.f32.mxu1 %vm505_vm2, %v497_v55 }
 0x1e1   : > { %v476_v57 = vpop.permute.xlu0 %475  ;;  %v416_v58 = vpop.permute.xlu1 %415 }
 0x1e2   : > { %v498_v59 = vadd.f32 %v476_v57, %v466_v56  ;;  %v436_v3 = vadd.f32 %v416_v58, %v2086_v32 }
 0x1e4   : > { %1683 = vmatmul.mubr.msk.f32.vlgmr.msra.gmra.mxu1 %vm505_vm2, %v498_v59 }
 0x1e5   : > { %v448_v60 = vpop.permute.xlu0 %447  ;;  %v446_v61 = vpop.permute.xlu1 %445 }
 0x1e6   : > { %v467_v63 = vadd.f32 %v446_v61, %v435_v62  ;;  %v468_v5 = vadd.f32 %v448_v60, %v436_v3 }
 0x1e9   : > { %v478_v1 = vpop.permute.xlu0 %477  ;;  %v418_v2 = vpop.permute.xlu1 %417 }
 0x1ea   : > { %v499_v4 = vadd.f32 %v478_v1, %v467_v63  ;;  %v437_v11 = vadd.f32 %v418_v2, %v2097_v37 }
 0x1ec   : > { %1685 = vmatprep.mubr.msk.f32.mxu1 %vm505_vm2, %v499_v4 }
 0x1ed   : > { %v480_v6 = vpop.permute.xlu0 %479  ;;  %v420_v7 = vpop.permute.xlu1 %419 }
 0x1ee   : > { %v500_v8 = vadd.f32 %v480_v6, %v468_v5  ;;  %v438_v16 = vadd.f32 %v420_v7, %v2104_v39 }
 0x1f0   : > { %1686 = vmatmul.mubr.msk.f32.gmra.mxu1 %vm505_vm2, %v500_v8 }
 0x1f1   : > { %v452_v9 = vpop.permute.xlu0 %451  ;;  %v450_v10 = vpop.permute.xlu1 %449 }
 0x1f2   : > { %v469_v13 = vadd.f32 %v450_v10, %v437_v11  ;;  %v470_v19 = vadd.f32 %v452_v9, %v438_v16 }
 0x1f5   : > { %v482_v14 = vpop.permute.xlu0 %481  ;;  %v422_v15 = vpop.permute.xlu1 %421 }
 0x1f6   : > { %v501_v18 = vadd.f32 %v482_v14, %v469_v13  ;;  %v439_v25 = vadd.f32 %v422_v15, %v2115_v43 }
 0x1f8   : > { %1688 = vmatprep.mubr.msk.f32.mxu1 %vm505_vm2, %v501_v18 }
 0x1f9   : > { %v484_v20 = vpop.permute.xlu0 %483  ;;  %v424_v21 = vpop.permute.xlu1 %423 }
 0x1fa   : > { %v502_v22 = vadd.f32 %v484_v20, %v470_v19  ;;  %v440_v26 = vadd.f32 %v424_v21, %v2122_v45 }
 0x1fc   : > { %1689 = vmatmul.mubr.msk.f32.gmra.mxu1 %vm505_vm2, %v502_v22 }
 0x1fd   : > { %v456_v23 = vpop.permute.xlu0 %455  ;;  %v454_v24 = vpop.permute.xlu1 %453 }
 0x1fe   : > { %v472_v27 = vadd.f32 %v456_v23, %v440_v26  ;;  %v471_v28 = vadd.f32 %v454_v24, %v439_v25 }
 0x201   : > { %v488_v29 = vpop.permute.xlu0 %487  ;;  %v486_v30 = vpop.permute.xlu1 %485 }
 0x202   : > { %v504_v31 = vadd.f32 %v488_v29, %v472_v27  ;;  %v503_v32 = vadd.f32 %v486_v30, %v471_v28 }
 0x204   : > { %1691 = vmatprep.mubr.msk.f32.mxu1 %vm505_vm2, %v503_v32 }
 0x205   : > { %1692 = vmatmul.mubr.msk.f32.gmra.mxu1 %vm505_vm2, %v504_v31 }
 0x206   : > { %1710 = vmatprep.mubr.msk.bf16.mxu1 %vm1925_vm0, %v1924_v0 }
 0x2a4   : > { %v1684_v34 = vpop.f32.mrf.mxu1 }
 0x2a5   : > { %v642_v35 = vsel %vm505_vm2, %v1684_v34, -inf }
 0x2a6   : > { %v643_v36 = vrot.slane %v642_v35, 4  ;;  %v596_v37 = vpop.f32.mrf.mxu1 }
 0x2a7   : > { %v635_v38 = vsel %vm505_vm2, %v596_v37, -inf }
 0x2a8   : > { %v644_v39 = vmax.f32 %v642_v35, %v643_v36  ;;  %v636_v40 = vrot.slane %v635_v38, 4 }
 0x2aa   : > { %v645_v41 = vrot.slane %v644_v39, 2  ;;  %v637_v42 = vmax.f32 %v635_v38, %v636_v40 }
 0x2ac   : > { %v646_v43 = vmax.f32 %v644_v39, %v645_v41  ;;  %v638_v44 = vrot.slane %v637_v42, 2 }
 0x2ae   : > { %v647_v45 = vrot.slane %v646_v43, 1  ;;  %v639_v46 = vmax.f32 %v637_v42, %v638_v44 }
 0x2b0   : > { %v648_v47 = vmax.f32 %v646_v43, %v647_v45  ;;  %v640_v48 = vrot.slane %v639_v46, 1  ;;  %v1687_v49 = vpop.f32.mrf.mxu1 }
 0x2b1   : > { %v656_v50 = vsel %vm505_vm2, %v1687_v49, -inf }
 0x2b2   : > { %v692_v51 = vsub.f32 %v1684_v34, %v648_v47  ;;  %v641_v52 = vmax.f32 %v639_v46, %v640_v48  ;;  %v657_v53 = vrot.slane %v656_v50, 4  ;;  %v606_v54 = vpop.f32.mrf.mxu1 }
 0x2b3   : > { %v649_v55 = vsel %vm505_vm2, %v606_v54, -inf }
 0x2b4   : > { %v701_v56 = vmul.f32 1.442695, %v692_v51  ;;  %v691_v57 = vsub.f32 %v596_v37, %v641_v52  ;;  %v658_v58 = vmax.f32 %v656_v50, %v657_v53  ;;  %v650_v59 = vrot.slane %v649_v55, 4 }
 0x2b6   : > { %1797 = vpow2.f32 %v701_v56  ;;  %v699_v60 = vmul.f32 1.442695, %v691_v57  ;;  %v659_v61 = vrot.slane %v658_v58, 2  ;;  %v651_v62 = vmax.f32 %v649_v55, %v650_v59 }
 0x2b8   : > { %1799 = vpow2.f32 %v699_v60  ;;  %v660_v63 = vmax.f32 %v658_v58, %v659_v61  ;;  %v652_v1 = vrot.slane %v651_v62, 2 }
 0x2ba   : > { %v661_v2 = vrot.slane %v660_v63, 1  ;;  %v653_v3 = vmax.f32 %v651_v62, %v652_v1 }
 0x2bc   : > { %v662_v4 = vmax.f32 %v660_v63, %v661_v2  ;;  %v654_v5 = vrot.slane %v653_v3, 1  ;;  %v1690_v6 = vpop.f32.mrf.mxu1 }
 0x2bd   : > { %v670_v7 = vsel %vm505_vm2, %v1690_v6, -inf }
 0x2be   : > { %v694_v8 = vsub.f32 %v1687_v49, %v662_v4  ;;  %v655_v9 = vmax.f32 %v653_v3, %v654_v5  ;;  %v671_v10 = vrot.slane %v670_v7, 4  ;;  %v616_v11 = vpop.f32.mrf.mxu1 }
 0x2bf   : > { %v663_v13 = vsel %vm505_vm2, %v616_v11, -inf }
 0x2c0   : > { %v705_v14 = vmul.f32 1.442695, %v694_v8  ;;  %v693_v15 = vsub.f32 %v606_v54, %v655_v9  ;;  %v672_v16 = vmax.f32 %v670_v7, %v671_v10  ;;  %v664_v18 = vrot.slane %v663_v13, 4 }
 0x2c2   : > { %1801 = vpow2.f32 %v705_v14  ;;  %v703_v19 = vmul.f32 1.442695, %v693_v15  ;;  %v673_v20 = vrot.slane %v672_v16, 2  ;;  %v665_v21 = vmax.f32 %v663_v13, %v664_v18 }
 0x2c3   : > { %v2168_v22 = vpop.eup %1797 }
 0x2c4   : > { %v722_v23 = vsel %vm505_vm2, %v2168_v22, 0.0  ;;  %1803 = vpow2.f32 %v703_v19  ;;  %v674_v24 = vmax.f32 %v672_v16, %v673_v20  ;;  %v666_v25 = vrot.slane %v665_v21, 2 }
 0x2c5   : > { %v2172_v26 = vpop.eup %1799  ;;  %v723_v27 = vrot.slane %v722_v23, 4  ;;  %v1693_v28 = vpop.f32.mrf.mxu1 }
 0x2c6   : > { %v715_v29 = vsel %vm505_vm2, %v2172_v26, 0.0  ;;  %v675_v30 = vrot.slane %v674_v24, 1  ;;  %v667_v31 = vmax.f32 %v665_v21, %v666_v25  ;;  %v684_v32 = vsel %vm505_vm2, %v1693_v28, -inf }
 0x2c7   : > { %v724_v33 = vadd.f32 %v723_v27, %v722_v23  ;;  %v716_v34 = vrot.slane %v715_v29, 4  ;;  %v685_v35 = vrot.slane %v684_v32, 4  ;;  %v626_v36 = vpop.f32.mrf.mxu1 }
 0x2c8   : > { %v676_v37 = vmax.f32 %v674_v24, %v675_v30  ;;  %v668_v38 = vrot.slane %v667_v31, 1  ;;  %v677_v39 = vsel %vm505_vm2, %v626_v36, -inf }
 0x2c9   : > { %v725_v40 = vrot.slane %v724_v33, 2  ;;  %v717_v41 = vadd.f32 %v716_v34, %v715_v29  ;;  %v686_v42 = vmax.f32 %v684_v32, %v685_v35  ;;  %v678_v43 = vrot.slane %v677_v39, 4 }
 0x2ca   : > { %v696_v44 = vsub.f32 %v1690_v6, %v676_v37  ;;  %v669_v45 = vmax.f32 %v667_v31, %v668_v38 }
 0x2cb   : > { %v726_v46 = vadd.f32 %v725_v40, %v724_v33  ;;  %v718_v47 = vrot.slane %v717_v41, 2  ;;  %v687_v48 = vrot.slane %v686_v42, 2  ;;  %v679_v49 = vmax.f32 %v677_v39, %v678_v43 }
 0x2cc   : > { %v709_v50 = vmul.f32 1.442695, %v696_v44  ;;  %v695_v51 = vsub.f32 %v616_v11, %v669_v45 }
 0x2cd   : > { %v727_v52 = vrot.slane %v726_v46, 1  ;;  %v719_v53 = vadd.f32 %v718_v47, %v717_v41  ;;  %v688_v54 = vmax.f32 %v686_v42, %v687_v48  ;;  %v680_v55 = vrot.slane %v679_v49, 2 }
 0x2ce   : > { %1805 = vpow2.f32 %v709_v50  ;;  %v707_v56 = vmul.f32 1.442695, %v695_v51 }
 0x2cf   : > { %v2178_v57 = vpop.eup %1801  ;;  %v728_v58 = vadd.f32 %v727_v52, %v726_v46  ;;  %v720_v59 = vrot.slane %v719_v53, 1  ;;  %v689_v60 = vrot.slane %v688_v54, 1  ;;  %v681_v61 = vmax.f32 %v679_v49, %v680_v55 }
 0x2d0   : > { %v736_v62 = vsel %vm505_vm2, %v2178_v57, 0.0  ;;  %1807 = vpow2.f32 %v707_v56 }
 0x2d1   : > { %v2182_v63 = vpop.eup %1803  ;;  %v721_v1 = vadd.f32 %v720_v59, %v719_v53  ;;  %v737_v2 = vrot.slane %v736_v62, 4  ;;  %v690_v3 = vmax.f32 %v688_v54, %v689_v60  ;;  %1809 = vrcp.f32 %v728_v58 }
 0x2d2   : > { %v729_v4 = vsel %vm505_vm2, %v2182_v63, 0.0  ;;  %v682_v5 = vrot.slane %v681_v61, 1 }
 0x2d3   : > { %v738_v6 = vadd.f32 %v737_v2, %v736_v62  ;;  %v730_v7 = vrot.slane %v729_v4, 4  ;;  %v698_v8 = vsub.f32 %v1693_v28, %v690_v3  ;;  %1811 = vrcp.f32 %v721_v1 }
 0x2d4   : > { %v683_v9 = vmax.f32 %v681_v61, %v682_v5 }
 0x2d5   : > { %v739_v10 = vrot.slane %v738_v6, 2  ;;  %v731_v11 = vadd.f32 %v730_v7, %v729_v4  ;;  %v713_v13 = vmul.f32 1.442695, %v698_v8 }
 0x2d6   : > { %v697_v14 = vsub.f32 %v626_v36, %v683_v9  ;;  %v1072_v9 = vld [vmem:[#allocation2 + $0x4] sm:$0xf] }
 0x2d7   : > { %v740_v15 = vadd.f32 %v739_v10, %v738_v6  ;;  %v732_v16 = vrot.slane %v731_v11, 2  ;;  %1813 = vpow2.f32 %v713_v13  ;;  %v1297_v10 = vld [vmem:[#allocation2 + $0x8] sm:$0xf] }
 0x2d8   : > { %v711_v18 = vmul.f32 1.442695, %v697_v14  ;;  %v1326_v13 = vsel %vm1107_vm3, %v1297_v10, 0  ;;  %v2210_v14 = vld [vmem:[%s2449_s3] sm:$0x3] }
 0x2d9   : > { %v741_v19 = vrot.slane %v740_v15, 1  ;;  %v733_v20 = vadd.f32 %v732_v16, %v731_v11  ;;  %v1109_v11 = vsel %vm1107_vm3, %v1072_v9, 0  ;;  %v2214_v16 = vpop.permute.xlu1 %996 }
 0x2da   : > { %1815 = vpow2.f32 %v711_v18  ;;  %1709 = vmatpush3.bf16.msra.mxu1 %v1109_v11  ;;  %v2218_v18 = vrot.slane %v2210_v14, %v2056_v17 }
 0x2db   : > { %v1806_v21 = vpop.eup %1805  ;;  %v742_v23 = vadd.f32 %v741_v19, %v740_v15  ;;  %v734_v24 = vrot.slane %v733_v20, 1  ;;  %1714 = vmatprep.subr.bf16.mxu1 %v1924_v0  ;;  %v2212_v15 = vpop.permute.xlu0 %920 }
 0x2dc   : > { %v750_v25 = vsel %vm505_vm2, %v1806_v21, 0.0 }
 0x2dd   : > { %v1808_v27 = vpop.eup %1807  ;;  %v735_v28 = vadd.f32 %v734_v24, %v733_v20  ;;  %v751_v29 = vrot.slane %v750_v25, 4  ;;  %1817 = vrcp.f32 %v742_v23  ;;  %v2223_v23 = vpop.permute.xlu1 %1221 }
 0x2de   : > { %v743_v30 = vsel %vm505_vm2, %v1808_v27, 0.0  ;;  %v1810_v31 = vpop.eup %1809 }
 0x2df   : > { %v752_v32 = vadd.f32 %v751_v29, %v750_v25  ;;  %v744_v33 = vrot.slane %v743_v30, 4  ;;  %1819 = vrcp.f32 %v735_v28  ;;  %v774_v38 = vmul.f32 %v1810_v31, %v2168_v22  ;;  %v2220_v20 = vpop.permute.xlu0 %1369 }
 0x2e0   : > { %v1812_v34 = vpop.eup %1811 }
 0x2e1   : > { %v753_v35 = vrot.slane %v752_v32, 2  ;;  %v745_v36 = vadd.f32 %v744_v33, %v743_v30  ;;  %v772_v37 = vmul.f32 %v1812_v34, %v2172_v26 }
 0x2e3   : > { %v754_v39 = vadd.f32 %v753_v35, %v752_v32  ;;  %v746_v40 = vrot.slane %v745_v36, 2  ;;  %1696 = vmatprep.mubr.msk.f32.mxu0 %vm505_vm2, %v772_v37 }
 0x2e4   : > { %v1814_v41 = vpop.eup %1813  ;;  %1697 = vmatmul.mubr.msk.f32.vlgmr.msra.gmra.mxu0 %vm505_vm2, %v774_v38 }
 0x2e5   : > { %v755_v42 = vrot.slane %v754_v39, 1  ;;  %v747_v43 = vadd.f32 %v746_v40, %v745_v36  ;;  %v764_v44 = vsel %vm505_vm2, %v1814_v41, 0.0  ;;  %1721 = vmatpush3.bf16.msra.mxu0 %v1326_v13 }
 0x2e6   : > { %v765_v45 = vrot.slane %v764_v44, 4 }
 0x2e7   : > { %v1816_v46 = vpop.eup %1815  ;;  %v756_v47 = vadd.f32 %v755_v42, %v754_v39  ;;  %v748_v48 = vrot.slane %v747_v43, 1 }
 0x2e8   : > { %v766_v49 = vadd.f32 %v765_v45, %v764_v44  ;;  %v757_v26 = vsel %vm505_vm2, %v1816_v46, 0.0 }
 0x2e9   : > { %v749_v50 = vadd.f32 %v748_v48, %v747_v43  ;;  %v758_v22 = vrot.slane %v757_v26, 4  ;;  %1821 = vrcp.f32 %v756_v47 }
 0x2ea   : > { %v767_v51 = vrot.slane %v766_v49, 2  ;;  %v1818_v52 = vpop.eup %1817 }
 0x2eb   : > { %v759_v53 = vadd.f32 %v758_v22, %v757_v26  ;;  %1823 = vrcp.f32 %v749_v50  ;;  %v778_v60 = vmul.f32 %v1818_v52, %v2178_v57 }
 0x2ec   : > { %v1820_v54 = vpop.eup %1819  ;;  %v768_v55 = vadd.f32 %v767_v51, %v766_v49 }
 0x2ed   : > { %v760_v56 = vrot.slane %v759_v53, 2  ;;  %v776_v58 = vmul.f32 %v1820_v54, %v2182_v63 }
 0x2ee   : > { %v769_v59 = vrot.slane %v768_v55, 1 }
 0x2ef   : > { %v761_v61 = vadd.f32 %v760_v56, %v759_v53  ;;  %1699 = vmatprep.mubr.msk.f32.mxu0 %vm505_vm2, %v776_v58 }
 0x2f0   : > { %v770_v62 = vadd.f32 %v769_v59, %v768_v55  ;;  %1700 = vmatmul.mubr.msk.f32.gmra.mxu0 %vm505_vm2, %v778_v60 }
 0x2f1   : > { %v762_v1 = vrot.slane %v761_v61, 1 }
 0x2f2   : > { %1825 = vrcp.f32 %v770_v62 }
 0x2f3   : > { %v763_v2 = vadd.f32 %v762_v1, %v761_v61 }
 0x2f5   : > { %1827 = vrcp.f32 %v763_v2 }
 0x2f6   : > { %v1822_v3 = vpop.eup %1821 }
 0x2f7   : > { %v782_v6 = vmul.f32 %v1822_v3, %v1806_v21 }
 0x2f8   : > { %v1824_v4 = vpop.eup %1823 }
 0x2f9   : > { %v780_v5 = vmul.f32 %v1824_v4, %v1808_v27 }
 0x2fb   : > { %1702 = vmatprep.mubr.msk.f32.mxu0 %vm505_vm2, %v780_v5 }
 0x2fc   : > { %1703 = vmatmul.mubr.msk.f32.gmra.mxu0 %vm505_vm2, %v782_v6 }
 0x2ff   : > { %v1826_v63 = vpop.eup %1825 }
 0x300   : > { %v786_v8 = vmul.f32 %v1826_v63, %v1814_v41 }
 0x302   : > { %v1828_v57 = vpop.eup %1827 }
 0x303   : > { %v784_v7 = vmul.f32 %v1828_v57, %v1816_v46 }
 0x305   : > { %1705 = vmatprep.mubr.msk.f32.mxu0 %vm505_vm2, %v784_v7 }
 0x306   : > { %1706 = vmatmul.mubr.msk.f32.gmra.mxu0 %vm505_vm2, %v786_v8 }
 0x307   : > { %1722 = vmatprep.mubr.msk.bf16.mxu0 %vm1925_vm0, %v1924_v0 }
 0x3a4   : > { %v1698_v19 = vpop.f32.mrf.mxu0 }
 0x3a5   : > { %v887_v21 = vadd.f32 %v1698_v19, %v2218_v18 }
 0x3a6   : > { %v881_v24 = vpop.f32.mrf.mxu0 }
 0x3a7   : > { %v924_v25 = vmul.f32 %v2212_v15, %v887_v21  ;;  %v1000_v27 = vmul.f32 %v2214_v16, %v887_v21  ;;  %v1225_v28 = vmul.f32 %v2223_v23, %v887_v21  ;;  %v1373_v29 = vmul.f32 %v2220_v20, %v887_v21 }
 0x3a8   : > { %v882_v30 = vadd.f32 %v881_v24, %v2218_v18 }
 0x3a9   : > { %v938_v17 = vsel %vm505_vm2, %v924_v25, 0.0  ;;  %v1014_v31 = vsel %vm505_vm2, %v1000_v27, 0.0  ;;  %v1239_v34 = vsel %vm505_vm2, %v1225_v28, 0.0  ;;  %v1387_v35 = vsel %vm505_vm2, %v1373_v29, 0.0 }
 0x3aa   : > { %v939_v32 = vrot.slane %v938_v17, 4  ;;  %v1015_v33 = vrot.slane %v1014_v31, 4  ;;  %v923_v36 = vmul.f32 %v2212_v15, %v882_v30  ;;  %v999_v37 = vmul.f32 %v2214_v16, %v882_v30 }
 0x3ab   : > { %v1224_v38 = vmul.f32 %v2223_v23, %v882_v30  ;;  %v1372_v39 = vmul.f32 %v2220_v20, %v882_v30  ;;  %v1240_v40 = vrot.slane %v1239_v34, 4  ;;  %v1388_v45 = vrot.slane %v1387_v35, 4 }
 0x3ac   : > { %v931_v41 = vsel %vm505_vm2, %v923_v36, 0.0  ;;  %v1007_v42 = vsel %vm505_vm2, %v999_v37, 0.0  ;;  %v940_v44 = vadd.f32 %v939_v32, %v938_v17  ;;  %v1016_v47 = vadd.f32 %v1015_v33, %v1014_v31 }
 0x3ad   : > { %v1232_v43 = vsel %vm505_vm2, %v1224_v38, 0.0  ;;  %v1380_v46 = vsel %vm505_vm2, %v1372_v39, 0.0  ;;  %v932_v48 = vrot.slane %v931_v41, 4  ;;  %v1008_v49 = vrot.slane %v1007_v42, 4 }
 0x3ae   : > { %v1233_v26 = vrot.slane %v1232_v43, 4  ;;  %v1241_v50 = vadd.f32 %v1240_v40, %v1239_v34  ;;  %v1381_v51 = vrot.slane %v1380_v46, 4  ;;  %v941_v53 = vrot.slane %v940_v44, 2 }
 0x3af   : > { %v933_v22 = vadd.f32 %v932_v48, %v931_v41  ;;  %v1009_v52 = vadd.f32 %v1008_v49, %v1007_v42  ;;  %v1017_v54 = vrot.slane %v1016_v47, 2  ;;  %v1389_v55 = vadd.f32 %v1388_v45, %v1387_v35 }
 0x3b0   : > { %v1234_v56 = vadd.f32 %v1233_v26, %v1232_v43  ;;  %v1242_v58 = vrot.slane %v1241_v50, 2  ;;  %v1382_v60 = vadd.f32 %v1381_v51, %v1380_v46  ;;  %v1701_v62 = vpop.f32.mrf.mxu0  ;;  %v942_v1 = vadd.f32 %v941_v53, %v940_v44 }
 0x3b1   : > { %v934_v59 = vrot.slane %v933_v22, 2  ;;  %v1010_v61 = vrot.slane %v1009_v52, 2  ;;  %v1018_v2 = vadd.f32 %v1017_v54, %v1016_v47  ;;  %v1390_v3 = vrot.slane %v1389_v55, 2 }
 0x3b2   : > { %v1235_v4 = vrot.slane %v1234_v56, 2  ;;  %v1243_v5 = vadd.f32 %v1242_v58, %v1241_v50  ;;  %v1383_v63 = vrot.slane %v1382_v60, 2  ;;  %v897_v7 = vadd.f32 %v1701_v62, %v2218_v18  ;;  %v891_v8 = vpop.f32.mrf.mxu0 }
 0x3b3   : > { %v935_v6 = vadd.f32 %v934_v59, %v933_v22  ;;  %v1011_v57 = vadd.f32 %v1010_v61, %v1009_v52  ;;  %v943_v9 = vrot.slane %v942_v1, 1  ;;  %v1019_v10 = vrot.slane %v1018_v2, 1 }
 0x3b4   : > { %v1391_v11 = vadd.f32 %v1390_v3, %v1389_v55  ;;  %v1236_v13 = vadd.f32 %v1235_v4, %v1234_v56  ;;  %v926_v19 = vmul.f32 %v2212_v15, %v897_v7  ;;  %v1002_v21 = vmul.f32 %v2214_v16, %v897_v7 }
 0x3b5   : > { %v1227_v24 = vmul.f32 %v2223_v23, %v897_v7  ;;  %v1375_v25 = vmul.f32 %v2220_v20, %v897_v7  ;;  %v1244_v27 = vrot.slane %v1243_v5, 1  ;;  %v936_v28 = vrot.slane %v935_v6, 1 }
 0x3b6   : > { %v1384_v29 = vadd.f32 %v1383_v63, %v1382_v60  ;;  %v892_v30 = vadd.f32 %v891_v8, %v2218_v18  ;;  %v1012_v17 = vrot.slane %v1011_v57, 1  ;;  %v952_v31 = vsel %vm505_vm2, %v926_v19, 0.0 }
 0x3b7   : > { %v1028_v32 = vsel %vm505_vm2, %v1002_v21, 0.0  ;;  %v1253_v33 = vsel %vm505_vm2, %v1227_v24, 0.0  ;;  %v944_v34 = vadd.f32 %v943_v9, %v942_v1  ;;  %v1020_v35 = vadd.f32 %v1019_v10, %v1018_v2 }
 0x3b8   : > { %v1392_v36 = vrot.slane %v1391_v11, 1  ;;  %v1401_v37 = vsel %vm505_vm2, %v1375_v25, 0.0  ;;  %v1237_v38 = vrot.slane %v1236_v13, 1  ;;  %v953_v39 = vrot.slane %v952_v31, 4 }
 0x3b9   : > { %v1029_v40 = vrot.slane %v1028_v32, 4  ;;  %v1254_v41 = vrot.slane %v1253_v33, 4  ;;  %v925_v42 = vmul.f32 %v2212_v15, %v892_v30  ;;  %v1001_v43 = vmul.f32 %v2214_v16, %v892_v30 }
 0x3ba   : > { %v1226_v44 = vmul.f32 %v2223_v23, %v892_v30  ;;  %v1374_v45 = vmul.f32 %v2220_v20, %v892_v30  ;;  %v937_v46 = vadd.f32 %v936_v28, %v935_v6  ;;  %v1013_v47 = vadd.f32 %v1012_v17, %v1011_v57 }
 0x3bb   : > { %v1385_v48 = vrot.slane %v1384_v29, 1  ;;  %v1402_v49 = vrot.slane %v1401_v37, 4  ;;  %v945_v26 = vsel %vm505_vm2, %v925_v42, 0.0  ;;  %v1021_v50 = vsel %vm505_vm2, %v1001_v43, 0.0 }
 0x3bc   : > { %v1246_v22 = vsel %vm505_vm2, %v1226_v44, 0.0  ;;  %v1394_v51 = vsel %vm505_vm2, %v1374_v45, 0.0  ;;  %v1238_v52 = vadd.f32 %v1237_v38, %v1236_v13  ;;  %v954_v53 = vadd.f32 %v953_v39, %v952_v31 }
 0x3bd   : > { %v1030_v54 = vadd.f32 %v1029_v40, %v1028_v32  ;;  %v1255_v55 = vadd.f32 %v1254_v41, %v1253_v33  ;;  %v946_v56 = vrot.slane %v945_v26, 4  ;;  %v1022_v58 = vrot.slane %v1021_v50, 4 }
 0x3be   : > { %v1247_v59 = vrot.slane %v1246_v22, 4  ;;  %v1395_v60 = vrot.slane %v1394_v51, 4  ;;  %v1245_v61 = vadd.f32 %v1244_v27, %v1243_v5  ;;  %v1393_v62 = vadd.f32 %v1392_v36, %v1391_v11 }
 0x3bf   : > { %v1063_v1 = vpack.c.bf16 %v1013_v47, %v1013_v47  ;;  %v1386_v2 = vadd.f32 %v1385_v48, %v1384_v29  ;;  %v1403_v3 = vadd.f32 %v1402_v49, %v1401_v37  ;;  %v947_v4 = vadd.f32 %v946_v56, %v945_v26 }
 0x3c0   : > { %v1023_v6 = vadd.f32 %v1022_v58, %v1021_v50  ;;  %v1248_v63 = vadd.f32 %v1247_v59, %v1246_v22  ;;  %v1064_v57 = vpack.c.bf16 %v1020_v35, %v1020_v35  ;;  %v987_v7 = vpack.c.bf16 %v937_v46, %v937_v46  ;;  %v1704_v35 = vpop.f32.mrf.mxu0 }
 0x3c1   : > { %v1288_v8 = vpack.c.bf16 %v1238_v52, %v1238_v52  ;;  %v955_v9 = vrot.slane %v954_v53, 2  ;;  %v1031_v10 = vrot.slane %v1030_v54, 2  ;;  %v1256_v13 = vrot.slane %v1255_v55, 2 }
 0x3c2   : > { %v1024_v19 = vrot.slane %v1023_v6, 2  ;;  %v1396_v21 = vadd.f32 %v1395_v60, %v1394_v51  ;;  %v988_v24 = vpack.c.bf16 %v944_v34, %v944_v34  ;;  %v1289_v25 = vpack.c.bf16 %v1245_v61, %v1245_v61  ;;  %v901_v50 = vpop.f32.mrf.mxu0 }
 0x3c3   : > { %v1437_v28 = vpack.c.bf16 %v1393_v62, %v1393_v62  ;;  %v1436_v30 = vpack.c.bf16 %v1386_v2, %v1386_v2  ;;  %v1081_v5 = vunpack.c.l.b16 %v1063_v1  ;;  %v1404_v11 = vrot.slane %v1403_v3, 2 }
 0x3c4   : > { %v948_v27 = vrot.slane %v947_v4, 2  ;;  %v1249_v29 = vrot.slane %v1248_v63, 2  ;;  %v1082_v17 = vunpack.c.l.b16 %v1064_v57  ;;  %v1159_v31 = vunpack.c.l.b16 %v987_v7 }
 0x3c5   : > { %v1306_v32 = vunpack.c.l.b16 %v1288_v8  ;;  %v956_v33 = vadd.f32 %v955_v9, %v954_v53  ;;  %v1032_v36 = vadd.f32 %v1031_v10, %v1030_v54  ;;  %v1257_v37 = vadd.f32 %v1256_v13, %v1255_v55 }
 0x3c6   : > { %v1025_v38 = vadd.f32 %v1024_v19, %v1023_v6  ;;  %v1397_v39 = vrot.slane %v1396_v21, 2  ;;  %v1160_v40 = vunpack.c.l.b16 %v988_v24  ;;  %v1307_v41 = vunpack.c.l.b16 %v1289_v25 }
 0x3c7   : > { %v2260_v42 = vunpack.c.l.b16 %v1437_v28  ;;  %v2262_v34 = vunpack.c.l.b16 %v1436_v30  ;;  %v2265_v43 = vsel %vm1089_vm4, %v1082_v17, %v1081_v5  ;;  %v1405_v44 = vadd.f32 %v1404_v11, %v1403_v3 }
 0x3c8   : > { %v949_v45 = vadd.f32 %v948_v27, %v947_v4  ;;  %v1250_v46 = vadd.f32 %v1249_v29, %v1248_v63  ;;  %v2268_v47 = vsel %vm1089_vm4, %v1160_v40, %v1159_v31  ;;  %v2271_v48 = vsel %vm1089_vm4, %v1307_v41, %v1306_v32 }
 0x3c9   : > { %v957_v49 = vrot.slane %v956_v33, 1  ;;  %v907_v26 = vadd.f32 %v1704_v35, %v2218_v18  ;;  %v1033_v22 = vrot.slane %v1032_v36, 1  ;;  %v1258_v51 = vrot.slane %v1257_v37, 1 }
 0x3ca   : > { %v1026_v52 = vrot.slane %v1025_v38, 1  ;;  %v1398_v53 = vadd.f32 %v1397_v39, %v1396_v21  ;;  %v1406_v59 = vrot.slane %v1405_v44, 1  ;;  %v950_v60 = vrot.slane %v949_v45, 1 }
 0x3cb   : > { %v928_v54 = vmul.f32 %v2212_v15, %v907_v26  ;;  %v1004_v55 = vmul.f32 %v2214_v16, %v907_v26  ;;  %v1229_v56 = vmul.f32 %v2223_v23, %v907_v26  ;;  %v1377_v58 = vmul.f32 %v2220_v20, %v907_v26 }
 0x3cc   : > { %v1251_v61 = vrot.slane %v1250_v46, 1  ;;  %v902_v62 = vadd.f32 %v901_v50, %v2218_v18  ;;  %v958_v6 = vadd.f32 %v957_v49, %v956_v33  ;;  %v1034_v63 = vadd.f32 %v1033_v22, %v1032_v36 }
 0x3cd   : > { %v966_v1 = vsel %vm505_vm2, %v928_v54, 0.0  ;;  %v1042_v2 = vsel %vm505_vm2, %v1004_v55, 0.0  ;;  %v1267_v3 = vsel %vm505_vm2, %v1229_v56, 0.0  ;;  %v1415_v4 = vsel %vm505_vm2, %v1377_v58, 0.0  ;;  %v1707_v55 = vpop.f32.mrf.mxu0 }
 0x3ce   : > { %v1027_v57 = vadd.f32 %v1026_v52, %v1025_v38  ;;  %v1399_v7 = vrot.slane %v1398_v53, 1  ;;  %v967_v8 = vrot.slane %v966_v1, 4  ;;  %v1043_v9 = vrot.slane %v1042_v2, 4 }
 0x3cf   : > { %v1268_v10 = vrot.slane %v1267_v3, 4  ;;  %v1416_v13 = vrot.slane %v1415_v4, 4  ;;  %v951_v19 = vadd.f32 %v950_v60, %v949_v45  ;;  %v927_v21 = vmul.f32 %v2212_v15, %v902_v62 }
 0x3d0   : > { %v1003_v24 = vmul.f32 %v2214_v16, %v902_v62  ;;  %v1228_v25 = vmul.f32 %v2223_v23, %v902_v62  ;;  %v1252_v28 = vadd.f32 %v1251_v61, %v1250_v46  ;;  %v968_v30 = vadd.f32 %v967_v8, %v966_v1 }
 0x3d1   : > { %v1044_v5 = vadd.f32 %v1043_v9, %v1042_v2  ;;  %v1269_v11 = vadd.f32 %v1268_v10, %v1267_v3  ;;  %v1417_v27 = vadd.f32 %v1416_v13, %v1415_v4  ;;  %v959_v29 = vsel %vm505_vm2, %v927_v21, 0.0 }
 0x3d2   : > { %v1035_v17 = vsel %vm505_vm2, %v1003_v24, 0.0  ;;  %v1260_v31 = vsel %vm505_vm2, %v1228_v25, 0.0  ;;  %v1259_v32 = vadd.f32 %v1258_v51, %v1257_v37  ;;  %v2289_v33 = vadd.f32 %v1406_v59, %v1405_v44 }
 0x3d3   : > { %v1065_v35 = vpack.c.bf16 %v1027_v57, %v1027_v57  ;;  %v969_v36 = vrot.slane %v968_v30, 2  ;;  %v1045_v38 = vrot.slane %v1044_v5, 2  ;;  %v1270_v39 = vrot.slane %v1269_v11, 2 }
 0x3d4   : > { %v960_v40 = vrot.slane %v959_v29, 4  ;;  %v1036_v41 = vrot.slane %v1035_v17, 4  ;;  %v1066_v45 = vpack.c.bf16 %v1034_v63, %v1034_v63  ;;  %v989_v46 = vpack.c.bf16 %v951_v19, %v951_v19 }
 0x3d5   : > { %v1400_v49 = vadd.f32 %v1399_v7, %v1398_v53  ;;  %v1261_v26 = vrot.slane %v1260_v31, 4  ;;  %v990_v50 = vpack.c.bf16 %v958_v6, %v958_v6  ;;  %v1290_v22 = vpack.c.bf16 %v1252_v28, %v1252_v28  ;;  %v911_v7 = vpop.f32.mrf.mxu0 }
 0x3d6   : > { %v970_v52 = vadd.f32 %v969_v36, %v968_v30  ;;  %v1418_v54 = vrot.slane %v1417_v27, 2  ;;  %v1291_v56 = vpack.c.bf16 %v1259_v32, %v1259_v32  ;;  %v1439_v37 = vpack.c.bf16 %v2289_v33, %v2289_v33 }
 0x3d7   : > { %v1083_v44 = vunpack.c.l.b16 %v1065_v35  ;;  %v1376_v51 = vmul.f32 %v2220_v20, %v902_v62  ;;  %v1046_v58 = vadd.f32 %v1045_v38, %v1044_v5  ;;  %v1271_v59 = vadd.f32 %v1270_v39, %v1269_v11 }
 0x3d8   : > { %v961_v60 = vadd.f32 %v960_v40, %v959_v29  ;;  %v1037_v61 = vadd.f32 %v1036_v41, %v1035_v17  ;;  %v1084_v1 = vunpack.c.l.b16 %v1066_v45  ;;  %v1161_v2 = vunpack.c.l.b16 %v989_v46 }
 0x3d9   : > { %v1438_v53 = vpack.c.bf16 %v1400_v49, %v1400_v49  ;;  %v1262_v3 = vadd.f32 %v1261_v26, %v1260_v31  ;;  %v2294_v4 = vunpack.c.l.b16 %v990_v50  ;;  %v1308_v6 = vunpack.c.l.b16 %v1290_v22 }
 0x3da   : > { %v971_v63 = vrot.slane %v970_v52, 1  ;;  %v1419_v57 = vadd.f32 %v1418_v54, %v1417_v27  ;;  %v1309_v8 = vunpack.c.l.b16 %v1291_v56  ;;  %v1092_v9 = vsel %vm1091_vm5, %v1083_v44, %v2265_v43 }
 0x3db   : > { %v1408_v62 = vsel %vm505_vm2, %v1376_v51, 0.0  ;;  %v917_v10 = vadd.f32 %v1707_v55, %v2218_v18  ;;  %v1047_v13 = vrot.slane %v1046_v58, 1  ;;  %v1272_v19 = vrot.slane %v1271_v59, 1 }
 0x3dc   : > { %v962_v21 = vrot.slane %v961_v60, 2  ;;  %v1038_v24 = vrot.slane %v1037_v61, 2  ;;  %v2302_v25 = vsel %vm1091_vm5, %v1161_v2, %v2268_v47  ;;  %v2304_v28 = vunpack.c.l.b16 %v1438_v53 }
 0x3dd   : > { %v1263_v30 = vrot.slane %v1262_v3, 2  ;;  %v912_v5 = vadd.f32 %v911_v7, %v2218_v18  ;;  %v1315_v43 = vsel %vm1091_vm5, %v1308_v6, %v2271_v48  ;;  %v2309_v11 = vadd.f32 %v971_v63, %v970_v52 }
 0x3de   : > { %v1420_v27 = vrot.slane %v1419_v57, 1  ;;  %v1409_v29 = vrot.slane %v1408_v62, 4  ;;  %v2312_v17 = vsel %vm1093_vm6, %v1084_v1, %v1092_v9  ;;  %v930_v31 = vmul.f32 %v2212_v15, %v917_v10 }
 0x3df   : > { %v1006_v47 = vmul.f32 %v2214_v16, %v917_v10  ;;  %v1231_v32 = vmul.f32 %v2223_v23, %v917_v10  ;;  %v2317_v35 = vadd.f32 %v1047_v13, %v1046_v58  ;;  %v2319_v36 = vadd.f32 %v1272_v19, %v1271_v59 }
 0x3e0   : > { %v963_v18 = vadd.f32 %v962_v21, %v961_v60  ;;  %v1039_v38 = vadd.f32 %v1038_v24, %v1037_v61  ;;  %v1264_v48 = vadd.f32 %v1263_v30, %v1262_v3  ;;  %v980_v39 = vsel %vm505_vm2, %v930_v31, 0.0 }
 0x3e1   : > { %v1056_v40 = vsel %vm505_vm2, %v1006_v47, 0.0  ;;  %v1281_v41 = vsel %vm505_vm2, %v1231_v32, 0.0  ;;  %v992_v45 = vpack.c.bf16 %v2309_v11, %v2309_v11  ;;  %v2326_v46 = vadd.f32 %v1420_v27, %v1419_v57 }
 0x3e2   : > { %v2329_v49 = vsel %vm1093_vm6, %v1309_v8, %v1315_v43  ;;  %v1410_v26 = vadd.f32 %v1409_v29, %v1408_v62  ;;  %v981_v50 = vrot.slane %v980_v39, 4  ;;  %v1057_v22 = vrot.slane %v1056_v40, 4 }
 0x3e3   : > { %v1282_v52 = vrot.slane %v1281_v41, 4  ;;  %v1379_v54 = vmul.f32 %v2220_v20, %v917_v10  ;;  %v1068_v55 = vpack.c.bf16 %v2317_v35, %v2317_v35  ;;  %v1293_v56 = vpack.c.bf16 %v2319_v36, %v2319_v36 }
 0x3e4   : > { %v964_v44 = vrot.slane %v963_v18, 1  ;;  %v929_v51 = vmul.f32 %v2212_v15, %v912_v5  ;;  %v1040_v58 = vrot.slane %v1039_v38, 1  ;;  %v1265_v59 = vrot.slane %v1264_v48, 1 }
 0x3e5   : > { %v1058_v60 = vadd.f32 %v1057_v22, %v1056_v40  ;;  %v1283_v61 = vadd.f32 %v1282_v52, %v1281_v41  ;;  %v1411_v1 = vrot.slane %v1410_v26, 2  ;;  %v1005_v53 = vmul.f32 %v2214_v16, %v912_v5 }
 0x3e6   : > { %v973_v2 = vsel %vm505_vm2, %v929_v51, 0.0  ;;  %v1230_v3 = vmul.f32 %v2223_v23, %v912_v5  ;;  %v982_v6 = vadd.f32 %v981_v50, %v980_v39  ;;  %v1429_v7 = vsel %vm505_vm2, %v1379_v54, 0.0 }
 0x3e7   : > { %v1059_v63 = vrot.slane %v1058_v60, 2  ;;  %v1284_v57 = vrot.slane %v1283_v61, 2  ;;  %v974_v8 = vrot.slane %v973_v2, 4  ;;  %v1049_v9 = vsel %vm505_vm2, %v1005_v53, 0.0 }
 0x3e8   : > { %v1274_v15 = vsel %vm505_vm2, %v1230_v3, 0.0  ;;  %v1378_v62 = vmul.f32 %v2220_v20, %v912_v5  ;;  %v1041_v10 = vadd.f32 %v1040_v58, %v1039_v38  ;;  %v1266_v13 = vadd.f32 %v1265_v59, %v1264_v48 }
 0x3e9   : > { %v1060_v19 = vadd.f32 %v1059_v63, %v1058_v60  ;;  %v1285_v21 = vadd.f32 %v1284_v57, %v1283_v61  ;;  %v975_v16 = vadd.f32 %v974_v8, %v973_v2  ;;  %v1050_v24 = vrot.slane %v1049_v9, 4 }
 0x3ea   : > { %v1275_v23 = vrot.slane %v1274_v15, 4  ;;  %v1422_v30 = vsel %vm505_vm2, %v1378_v62, 0.0  ;;  %v1412_v43 = vadd.f32 %v1411_v1, %v1410_v26  ;;  %v983_v27 = vrot.slane %v982_v6, 2 }
 0x3eb   : > { %v1061_v29 = vrot.slane %v1060_v19, 1  ;;  %v1430_v31 = vrot.slane %v1429_v7, 4  ;;  %v976_v47 = vrot.slane %v975_v16, 2  ;;  %v1051_v32 = vadd.f32 %v1050_v24, %v1049_v9 }
 0x3ec   : > { %v1276_v39 = vadd.f32 %v1275_v23, %v1274_v15  ;;  %v1423_v40 = vrot.slane %v1422_v30, 4  ;;  %v965_v41 = vadd.f32 %v964_v44, %v963_v18  ;;  %v1067_v20 = vpack.c.bf16 %v1041_v10, %v1041_v10 }
 0x3ed   : > { %v1292_v5 = vpack.c.bf16 %v1266_v13, %v1266_v13  ;;  %v1286_v38 = vrot.slane %v1285_v21, 1  ;;  %v977_v48 = vadd.f32 %v976_v47, %v975_v16  ;;  %v1052_v50 = vrot.slane %v1051_v32, 2 }
 0x3ee   : > { %v1277_v22 = vrot.slane %v1276_v39, 2  ;;  %v1424_v52 = vadd.f32 %v1423_v40, %v1422_v30  ;;  %v1413_v54 = vrot.slane %v1412_v43, 1  ;;  %v984_v51 = vadd.f32 %v983_v27, %v982_v6  ;;  %v995_v40 = vld [vmem:[#allocation2] sm:$0xf] }
 0x3ef   : > { %v1062_v58 = vadd.f32 %v1061_v29, %v1060_v19  ;;  %v1431_v26 = vadd.f32 %v1430_v31, %v1429_v7  ;;  %v978_v59 = vrot.slane %v977_v48, 1  ;;  %v1053_v60 = vadd.f32 %v1052_v50, %v1051_v32 }
 0x3f0   : > { %v1278_v61 = vadd.f32 %v1277_v22, %v1276_v39  ;;  %v1425_v1 = vrot.slane %v1424_v52, 2  ;;  %v991_v2 = vpack.c.bf16 %v965_v41, %v965_v41  ;;  %v1085_v18 = vunpack.c.l.b16 %v1067_v20 }
 0x3f1   : > { %v1310_v44 = vunpack.c.l.b16 %v1292_v5  ;;  %v1287_v53 = vadd.f32 %v1286_v38, %v1285_v21  ;;  %v979_v3 = vadd.f32 %v978_v59, %v977_v48  ;;  %v1054_v63 = vrot.slane %v1053_v60, 1 }
 0x3f2   : > { %v1279_v57 = vrot.slane %v1278_v61, 1  ;;  %v1426_v8 = vadd.f32 %v1425_v1, %v1424_v52  ;;  %v1086_v6 = vunpack.c.l.b16 %v1068_v55  ;;  %v1414_v9 = vadd.f32 %v1413_v54, %v1412_v43 }
 0x3f3   : > { %v985_v7 = vrot.slane %v984_v51, 1  ;;  %v1432_v15 = vrot.slane %v1431_v26, 2  ;;  %v1164_v62 = vunpack.c.l.b16 %v992_v45  ;;  %v1070_v10 = vpack.c.bf16 %v1062_v58, %v1062_v58 }
 0x3f4   : > { %v1055_v13 = vadd.f32 %v1054_v63, %v1053_v60  ;;  %v1280_v19 = vadd.f32 %v1279_v57, %v1278_v61  ;;  %v1096_v21 = vsel %vm1095_vm7, %v1085_v18, %v2312_v17  ;;  %v1163_v16 = vunpack.c.l.b16 %v991_v2  ;;  %v1445_v18 = vld [vmem:[#allocation2 + $0xc] sm:$0xf] }
 0x3f5   : > { %v1317_v24 = vsel %vm1095_vm7, %v1310_v44, %v2329_v49  ;;  %v1295_v23 = vpack.c.bf16 %v1287_v53, %v1287_v53  ;;  %v993_v35 = vpack.c.bf16 %v979_v3, %v979_v3  ;;  %v1427_v43 = vrot.slane %v1426_v8, 1 }
 0x3f6   : > { %v1069_v55 = vpack.c.bf16 %v1055_v13, %v1055_v13  ;;  %v1294_v30 = vpack.c.bf16 %v1280_v19, %v1280_v19  ;;  %v1311_v11 = vunpack.c.l.b16 %v1293_v56  ;;  %v1440_v45 = vpack.c.bf16 %v1414_v9, %v1414_v9 }
 0x3f7   : > { %v986_v27 = vadd.f32 %v985_v7, %v984_v51  ;;  %v1433_v29 = vadd.f32 %v1432_v15, %v1431_v26  ;;  %v1088_v31 = vunpack.c.l.b16 %v1070_v10  ;;  %v1169_v17 = vsel %vm1093_vm6, %v2294_v4, %v2302_v25 }
 0x3f8   : > { %v1087_v47 = vunpack.c.l.b16 %v1069_v55  ;;  %v1312_v32 = vunpack.c.l.b16 %v1294_v30  ;;  %v1313_v49 = vunpack.c.l.b16 %v1295_v23  ;;  %v1098_v39 = vsel %vm1097_vm8, %v1086_v6, %v1096_v21 }
 0x3f9   : > { %v1318_v41 = vsel %vm1097_vm8, %v1311_v11, %v1317_v24  ;;  %v1170_v20 = vsel %vm1095_vm7, %v1163_v16, %v1169_v17  ;;  %v1165_v36 = vunpack.c.l.b16 %v993_v35  ;;  %v1428_v56 = vadd.f32 %v1427_v43, %v1426_v8 }
 0x3fa   : > { %v1100_v5 = vsel %vm1099_vm9, %v1087_v47, %v1098_v39  ;;  %v1319_v38 = vsel %vm1099_vm9, %v1312_v32, %v1318_v41  ;;  %v994_v48 = vpack.c.bf16 %v986_v27, %v986_v27  ;;  %v1434_v50 = vrot.slane %v1433_v29, 1 }
 0x3fb   : > { %v1102_v22 = vsel %vm1101_vm10, %v1088_v31, %v1100_v5  ;;  %v1320_v4 = vsel %vm1101_vm10, %v1313_v49, %v1319_v38  ;;  %v1179_v52 = vsel %vm1107_vm3, %v995_v40, 0  ;;  %v1462_v51 = vsel %vm1089_vm4, %v2260_v42, %v2262_v34 }
 0x3fc   : > { %v1103_v25 = vpack.c.b16 %v1102_v22, %v1102_v22  ;;  %v1321_v54 = vpack.c.b16 %v1320_v4, %v1320_v4  ;;  %v1171_v58 = vsel %vm1097_vm8, %v1164_v62, %v1170_v20  ;;  %v1463_v26 = vsel %vm1091_vm5, %v2304_v28, %v1462_v51 }
 0x3fd   : > { %v1458_v59 = vunpack.c.l.b16 %v1440_v45  ;;  %v1442_v60 = vpack.c.bf16 %v1428_v56, %v1428_v56  ;;  %v1172_v61 = vsel %vm1099_vm9, %v1165_v36, %v1171_v58  ;;  %v1457_v1 = vunpack.c.l.b16 %v1439_v37 }
 0x3fe   : > { %1711 = vmatmul.mubr.msk.bf16.vlgmr.msra.gmra.mxu1 %vm505_vm2, %v1103_v25  ;;  %1723 = vmatmul.mubr.msk.bf16.vlgmr.msra.gmra.mxu0 %vm505_vm2, %v1321_v54  ;;  %v1441_v42 = vpack.c.bf16 %v2326_v46, %v2326_v46  ;;  %v1166_v34 = vunpack.c.l.b16 %v994_v48  ;;  %v1435_v2 = vadd.f32 %v1434_v50, %v1433_v29  ;;  %v1474_v46 = vsel %vm1107_vm3, %v1445_v18, 0 }
 0x3ff   : > { %1715 = vmatpush3.bf16.msra.mxu1 %v1179_v52  ;;  %1716 = vmatprep.mubr.msk.bf16.mxu1 %vm1925_vm0, %v1924_v0  ;;  %v1464_v44 = vsel %vm1093_vm6, %v1457_v1, %v1463_v26  ;;  %v1460_v53 = vunpack.c.l.b16 %v1442_v60 }
 0x400   : > { %1726 = vmatprep.subr.bf16.mxu1 %v1924_v0  ;;  %v1173_v28 = vsel %vm1101_vm10, %v1166_v34, %v1172_v61  ;;  %v1465_v33 = vsel %vm1095_vm7, %v1458_v59, %v1464_v44  ;;  %v1459_v37 = vunpack.c.l.b16 %v1441_v42  ;;  %v1443_v3 = vpack.c.bf16 %v1435_v2, %v1435_v2 }
 0x401   : > { %v1174_v63 = vpack.c.b16 %v1173_v28, %v1173_v28 }
 0x402   : > { %v1466_v57 = vsel %vm1097_vm8, %v1459_v37, %v1465_v33  ;;  %v1461_v6 = vunpack.c.l.b16 %v1443_v3 }
 0x403   : > { %v1467_v8 = vsel %vm1099_vm9, %v1460_v53, %v1466_v57 }
 0x404   : > { %v1468_v9 = vsel %vm1101_vm10, %v1461_v6, %v1467_v8 }
 0x405   : > { %v1469_v7 = vpack.c.b16 %v1468_v9, %v1468_v9 }
 0x406   : > { %1717 = vmatmul.mubr.msk.bf16.vlgmr.msra.gmra.mxu1 %vm505_vm2, %v1174_v63 }
 0x407   : > { %1727 = vmatpush3.bf16.msra.mxu1 %v1474_v46  ;;  %1728 = vmatprep.mubr.msk.bf16.mxu1 %vm1925_vm0, %v1924_v0  ;;  %v1519_v0 = vsub.s32 1, %v2051_v12 }
 0x409   : > { %v1520_v45 = vrot.slane %v2210_v14, %v1519_v0 }
 0x40e   : > { %1729 = vmatmul.mubr.msk.bf16.vlgmr.msra.gmra.mxu1 %vm505_vm2, %v1469_v7 }
 0x4be   : > { %v1145_v15 = vpop.f32.mrf.mxu1  ;;  %v1362_v62 = vpop.f32.mrf.mxu0 }
 0x4c0   : > { %v1712_v10 = vpop.f32.mrf.mxu1  ;;  %v1724_v13 = vpop.f32.mrf.mxu0 }
 0x4c2   : > { %v1148_v19 = vpop.f32.mrf.mxu1  ;;  %v1365_v21 = vpop.f32.mrf.mxu0 }
 0x4c4   : > { %v1713_v16 = vpop.f32.mrf.mxu1  ;;  %v1725_v24 = vpop.f32.mrf.mxu0 }
 0x4c6   : > { %v1215_v23 = vpop.f32.mrf.mxu1 }
 0x4c7   : > { %v1216_v55 = vadd.f32 %v1215_v23, %v1145_v15 }
 0x4c8   : > { %v1718_v35 = vpop.f32.mrf.mxu1 }
 0x4c9   : > { %v1368_v11 = vadd.f32 %v1362_v62, %v1216_v55 }
 0x4ca   : > { %v1218_v30 = vpop.f32.mrf.mxu1 }
 0x4cc   : > { %v1719_v43 = vpop.f32.mrf.mxu1 }
 0x4ce   : > { %v1510_v27 = vpop.f32.mrf.mxu1 }
 0x4cf   : > { %v1516_v29 = vadd.f32 %v1510_v27, %v1368_v11 }
 0x4d0   : > { %v1730_v31 = vpop.f32.mrf.mxu1 }
 0x4d1   : > { %v1521_v47 = vadd.f32 %v1520_v45, %v1516_v29 }
 0x4d2   : > { %v1513_v12 = vpop.f32.mrf.mxu1 }
 0x4d3   : > { %1522 = vst.msk [vmem:[%s230_s7] sm:$0xff] %vm253_vm1, %v1521_v47 }
 0x4d4   : > { %v1731_v14 = vpop.f32.mrf.mxu1 }
 0x4d5   : > { %1868 = shalt.err (!%p1865_p0)
}
 0x4d6   : > { %s1869_s16 = scalar_lea.hbm %s2404_s11, 128  ;;  %s1873_s25 = scalar_lea.hbm %s2451_s5, 256 }
 0x4d7   : > { %p1870_p1 = scmp.ne.s32.totalorder %s2404_s11, %s1869_s16  ;;  %p1874_p4 = scmp.lt.s32.totalorder %s2404_s11, %s2451_s5 }
 0x4d8   : > { %p1875_p7 = scmp.lt.s32.totalorder %s1873_s25, %s1869_s16 }
 0x4d9   : > { %p1871_p2 = pnand %p1870_p1, %p2004_p5 }
 0x4da   : > { %p1876_p8 = por %p1875_p7, %p1874_p4 }
 0x4db   : > { %p1872_p3 = pneg %p1871_p2 }
 0x4dd   : > { %p1877_p6 = pnand %p1876_p8, %p1872_p3 }
 0x4df   : > { %1880 = shalt.err (!%p1877_p6)
}
 0x4e0   : > { %1736 = dma.vmem_to_hbm [thread:$0]  (%p2004_p5), %s2406_s8, 128, %s2404_s11, %s1524_s22  }
 0x4e1 PF: > { %p1748_p9 = scmp.ge.s32.totalorder %s1919_s21, 2  ;;  %s1549_s6 = sand.u32 1, %s1907_s18  }
 0x4e2   : > { %p2455_p10 = scmp.ne.s32.totalorder %s2453_s29, 0  ;;  %s1550_s7 = scalar_lea.sflag [#allocation4], %s1549_s6 }
 0x4e4   : > { %p1743_p11 = pnand %p1748_p9, %p2455_p10 }
 0x4e6   : > { %p1744_p12 = pneg %p1743_p11 }
 0x4e8   : > { %1902 = dma.done.wait (%p1744_p12), %s1550_s7, 128  }
 0x4e9   : > { %1904 = vsyncadd (%p1744_p12), %s1550_s7, 4294967168  ;;  %p16_p13 = scmp.ge.s32.totalorder %s1991_s24, 4   ;;  %s2456_s18 = smov %s1911_s19 }
 0x4ea   : > { %s2457_s19 = smov %s1915_s20  ;;  %s2458_s20 = smov %s2002_s27 }
 0x4eb   : > { %s2459_s21 = smov %s1991_s24  ;;  %18 = sbr.rel (!%p16_p13) target bundleno = 4 (0x4), region = 83 }
 0x4f0   :  { %1555 = vsyncpa [#allocation3], 1 }
 0x4f1   :  { %1557 = vsyncpa [#allocation3 + $0x1], 1 }
 0x4f2   :  { %1558 = vsyncpa [#allocation4], 1 }
 0x4f3   :  { %1560 = vsyncpa [#allocation4 + $0x1], 1 }

</bundles_post_ra>
